<compile_context>
chip_gen: v5e
topology: v5e:2x2
jax: 0.10.0
libtpu: 0.0.40
codegen_flags: <defaults>
</compile_context>

<pallas_src>
from functools import partial

import jax
import jax.numpy as jnp
from jax.experimental import pallas as pl
from jax.experimental.pallas import tpu as pltpu


# ------------------------------ fused kernel --------------------------------

def _fused_mha_kernel(x_ref, wqkv_ref, bqkv_ref, wproj_ref, bproj_ref, o_ref,
                      *, num_heads):
    # Blocks (one grid step == one batch element):
    #   x_ref:     (1, n, c)   f32
    #   wqkv_ref:  (c, 3c)     bf16   columns ordered [q | k | v], head-major,
    #                                 q columns pre-scaled by head_dim**-0.5
    #   bqkv_ref:  (1, 3c)     f32    matching column order / pre-scaling
    #   wproj_ref: (c, c)      bf16
    #   bproj_ref: (1, c)      f32
    #   o_ref:     (1, n, c)   f32
    n = x_ref.shape[1]
    c = x_ref.shape[2]
    hd = c // num_heads

    x2d = x_ref[0].astype(jnp.bfloat16)                                # (n, c)

    # One lane-dense fused QKV matmul + one lane-dense bias add.
    qkv = jnp.dot(x2d, wqkv_ref[...], preferred_element_type=jnp.float32)
    qkv = qkv + bqkv_ref[...]                                          # (n, 3c) f32
    qkv_bf = qkv.astype(jnp.bfloat16)                                  # single cast

    # Attention core per head (H is tiny; static unroll, no serial deps).
    heads_out = []
    for h in range(num_heads):
        q = qkv_bf[:, h * hd:(h + 1) * hd]                             # (n, hd), pre-scaled
        k = qkv_bf[:, c + h * hd:c + (h + 1) * hd]                     # (n, hd)
        v = qkv_bf[:, 2 * c + h * hd:2 * c + (h + 1) * hd]             # (n, hd)

        # Scores: contract last dims directly (no materialized k.T).
        s = jax.lax.dot_general(q, k,
                                dimension_numbers=(((1,), (1,)), ((), ())),
                                preferred_element_type=jnp.float32)    # (n, n) f32

        # Softmax over the last dim, fp32 throughout, exact normalization.
        m = jnp.max(s, axis=-1, keepdims=True)
        p = jnp.exp(s - m)
        p = p / jnp.sum(p, axis=-1, keepdims=True)

        heads_out.append(jnp.dot(p.astype(jnp.bfloat16), v,
                                 preferred_element_type=jnp.float32))  # (n, hd)

    # Concatenate heads back to the lane-dense (n, c) layout and do the output
    # projection as a single K=c contraction.
    o_cat = jnp.concatenate(heads_out, axis=-1).astype(jnp.bfloat16)   # (n, c)
    out = jnp.dot(o_cat, wproj_ref[...], preferred_element_type=jnp.float32)
    o_ref[0] = out + bproj_ref[...]


# ------------------------------ module wrapper ------------------------------

def init_params(key, dim):
    k1, k2, k3, k4 = jax.random.split(key, 4)
    return {
        # stored as (in_features, out_features): x @ W + b == PyTorch x @ W.T + b
        "qkv_w": jax.random.normal(k1, (dim, 3 * dim), jnp.float32) * 0.02,
        "qkv_b": jax.random.normal(k2, (3 * dim,), jnp.float32) * 0.02,
        "proj_w": jax.random.normal(k3, (dim, dim), jnp.float32) * 0.02,
        "proj_b": jax.random.normal(k4, (dim,), jnp.float32) * 0.02,
    }


def vanilla_attention_forward(x, params, num_heads):
    b, n, c = x.shape
    hd = c // num_heads
    scale = float(hd) ** -0.5

    # Host-side (jit constant-folded) weight prep: fold the softmax scale into
    # the q columns of the QKV weight/bias; keep everything lane-dense.
    col_scale = jnp.where(jnp.arange(3 * c) < c, scale, 1.0).astype(jnp.float32)
    wqkv = (params["qkv_w"] * col_scale[None, :]).astype(jnp.bfloat16)   # (c, 3c)
    bqkv = (params["qkv_b"] * col_scale).reshape(1, 3 * c)               # (1, 3c) f32
    wproj = params["proj_w"].astype(jnp.bfloat16)                        # (c, c)
    bproj = params["proj_b"].reshape(1, c)                               # (1, c) f32

    flops = (2 * b * n * c * 3 * c              # fused qkv projection
             + 4 * b * num_heads * n * n * hd   # QK^T and PV
             + 2 * b * n * c * c)               # output projection
    transcendentals = b * num_heads * n * n     # exp in softmax
    bytes_accessed = (b * n * c * 4             # x in (f32)
                      + b * n * c * 4           # out (f32)
                      + wqkv.size * 2 + wproj.size * 2
                      + bqkv.size * 4 + bproj.size * 4)

    # grid=(b,) "parallel": one batch element per TC on v7x; on single-TC
    # v5e/v6e this is a 2-step serial loop (acceptable ~0.35us/step overhead).
    out = pl.pallas_call(
        partial(_fused_mha_kernel, num_heads=num_heads),
        out_shape=jax.ShapeDtypeStruct((b, n, c), jnp.float32),
        grid=(b,),
        in_specs=[
            pl.BlockSpec((1, n, c), lambda i: (i, 0, 0)),      # x
            pl.BlockSpec((c, 3 * c), lambda i: (0, 0)),        # Wqkv (lane-dense)
            pl.BlockSpec((1, 3 * c), lambda i: (0, 0)),        # bqkv (lane-dense)
            pl.BlockSpec((c, c), lambda i: (0, 0)),            # Wproj
            pl.BlockSpec((1, c), lambda i: (0, 0)),            # bproj
        ],
        out_specs=pl.BlockSpec((1, n, c), lambda i: (i, 0, 0)),
        compiler_params=pltpu.CompilerParams(
            dimension_semantics=("parallel",)),
        cost_estimate=pl.CostEstimate(flops=flops,
                                      transcendentals=transcendentals,
                                      bytes_accessed=bytes_accessed),
    )(x, wqkv, bqkv, wproj, bproj)
    return out


def reference_forward(x, params, num_heads):
    b, n, c = x.shape
    hd = c // num_heads
    scale = float(hd) ** -0.5
    qkv = x @ params["qkv_w"] + params["qkv_b"]
    qkv = qkv.reshape(b, n, 3, num_heads, hd).transpose(2, 0, 3, 1, 4)
    q, k, v = qkv[0], qkv[1], qkv[2]
    q = q * scale
    attn = jnp.einsum("bhqd,bhkd->bhqk", q, k)
    attn = jax.nn.softmax(attn, axis=-1)
    out = jnp.einsum("bhqk,bhkd->bhqd", attn, v)
    out = out.transpose(0, 2, 1, 3).reshape(b, n, c)
    return out @ params["proj_w"] + params["proj_b"]


if __name__ == "__main__":
    dim = 32
    num_heads = 4
    b, n = 2, 64  # img_size arg of the PyTorch forward is unused; n = H*W = 8*8

    key = jax.random.PRNGKey(0)
    kx, kp = jax.random.split(key)
    x = jax.random.normal(kx, (b, n, dim), jnp.float32)
    params = init_params(kp, dim)

    fwd = jax.jit(partial(vanilla_attention_forward, num_heads=num_heads))
    out = fwd(x, params)
    out = jax.block_until_ready(out)

    ref = reference_forward(x, params, num_heads)
    assert out.shape == (b, n, dim)
    max_err = float(jnp.max(jnp.abs(out - ref)))
    # bf16 MXU operands -> compare with a moderately loosened tolerance
    assert jnp.allclose(out, ref, atol=1e-2, rtol=1e-2), (
        f"mismatch vs reference (max abs err {max_err})")

    print("KERNEL_OK")
</pallas_src>

<mosaic_0001>
module attributes {stable_mosaic.version = 11 : i64} {
  func.func @_fused_mha_kernel(%arg0: i32, %arg1: memref<1x64x32xf32, #tpu.memory_space<vmem>>, %arg2: memref<32x96xbf16, #tpu.memory_space<vmem>>, %arg3: memref<1x96xf32, #tpu.memory_space<vmem>>, %arg4: memref<32x32xbf16, #tpu.memory_space<vmem>>, %arg5: memref<1x32xf32, #tpu.memory_space<vmem>>, %arg6: memref<1x64x32xf32, #tpu.memory_space<vmem>>) attributes {dimension_semantics = [#tpu.dimension_semantics<parallel>], iteration_bounds = array<i64: 2>, scalar_prefetch = 0 : i64, scratch_operands = 0 : i64, tpu.core_type = #tpu.core_type<tc>, window_params = [{transform_indices = @transform_0, window_bounds = array<i64: 1, 64, 32>}, {pipeline_mode = #tpu.pipeline_mode<synchronous>, transform_indices = @transform_1, window_bounds = array<i64: 32, 96>}, {pipeline_mode = #tpu.pipeline_mode<synchronous>, transform_indices = @transform_2, window_bounds = array<i64: 1, 96>}, {pipeline_mode = #tpu.pipeline_mode<synchronous>, transform_indices = @transform_3, window_bounds = array<i64: 32, 32>}, {pipeline_mode = #tpu.pipeline_mode<synchronous>, transform_indices = @transform_4, window_bounds = array<i64: 1, 32>}, {transform_indices = @transform_5, window_bounds = array<i64: 1, 64, 32>}]} {
    %c0 = arith.constant 0 : index
    %c0_0 = arith.constant 0 : index
    %c0_1 = arith.constant 0 : index
    %0 = vector.load %arg1[%c0, %c0_0, %c0_1] : memref<1x64x32xf32, #tpu.memory_space<vmem>>, vector<1x64x32xf32>
    %1 = vector.shape_cast %0 : vector<1x64x32xf32> to vector<64x32xf32>
    %2 = arith.truncf %1 : vector<64x32xf32> to vector<64x32xbf16>
    %c0_2 = arith.constant 0 : index
    %c0_3 = arith.constant 0 : index
    %3 = vector.load %arg2[%c0_2, %c0_3] : memref<32x96xbf16, #tpu.memory_space<vmem>>, vector<32x96xbf16>
    %cst = arith.constant dense<0.000000e+00> : vector<64x96xf32>
    %4 = tpu.matmul %2, %3, %cst {dimension_numbers = #tpu.dot_dimension_numbers<[1], [0], [0], [1], [0, 0, 1, 1], [], []>} : vector<64x32xbf16>, vector<32x96xbf16>, vector<64x96xf32> -> vector<64x96xf32>
    %c0_4 = arith.constant 0 : index
    %c0_5 = arith.constant 0 : index
    %5 = vector.load %arg3[%c0_4, %c0_5] : memref<1x96xf32, #tpu.memory_space<vmem>>, vector<1x96xf32>
    %6 = vector.broadcast %5 : vector<1x96xf32> to vector<64x96xf32>
    %7 = arith.addf %4, %6 : vector<64x96xf32>
    %8 = arith.truncf %7 : vector<64x96xf32> to vector<64x96xbf16>
    %9 = vector.extract_strided_slice %8 {offsets = [0, 0], sizes = [64, 8], strides = [1, 1]} : vector<64x96xbf16> to vector<64x8xbf16>
    %10 = vector.extract_strided_slice %8 {offsets = [0, 32], sizes = [64, 8], strides = [1, 1]} : vector<64x96xbf16> to vector<64x8xbf16>
    %11 = vector.extract_strided_slice %8 {offsets = [0, 64], sizes = [64, 8], strides = [1, 1]} : vector<64x96xbf16> to vector<64x8xbf16>
    %cst_6 = arith.constant dense<0.000000e+00> : vector<64x64xf32>
    %12 = tpu.matmul %9, %10, %cst_6 {dimension_numbers = #tpu.dot_dimension_numbers<[1], [1], [0], [0], [0, 0, 1, 0], [], []>} : vector<64x8xbf16>, vector<64x8xbf16>, vector<64x64xf32> -> vector<64x64xf32>
    %cst_7 = arith.constant dense<0xFF800000> : vector<64xf32>
    %13 = vector.multi_reduction <maximumf>, %12, %cst_7 [1] : vector<64x64xf32> to vector<64xf32>
    %14 = vector.shape_cast %13 : vector<64xf32> to vector<64x1xf32>
    %15 = vector.broadcast %14 : vector<64x1xf32> to vector<64x64xf32>
    %16 = arith.subf %12, %15 : vector<64x64xf32>
    %17 = math.exp %16 : vector<64x64xf32>
    %cst_8 = arith.constant dense<0.000000e+00> : vector<64xf32>
    %18 = vector.multi_reduction <add>, %17, %cst_8 [1] : vector<64x64xf32> to vector<64xf32>
    %19 = vector.shape_cast %18 : vector<64xf32> to vector<64x1xf32>
    %20 = vector.broadcast %19 : vector<64x1xf32> to vector<64x64xf32>
    %21 = arith.divf %17, %20 : vector<64x64xf32>
    %22 = arith.truncf %21 : vector<64x64xf32> to vector<64x64xbf16>
    %cst_9 = arith.constant dense<0.000000e+00> : vector<64x8xf32>
    %23 = tpu.matmul %22, %11, %cst_9 {dimension_numbers = #tpu.dot_dimension_numbers<[1], [0], [0], [1], [0, 0, 1, 1], [], []>} : vector<64x64xbf16>, vector<64x8xbf16>, vector<64x8xf32> -> vector<64x8xf32>
    %24 = vector.extract_strided_slice %8 {offsets = [0, 8], sizes = [64, 8], strides = [1, 1]} : vector<64x96xbf16> to vector<64x8xbf16>
    %25 = vector.extract_strided_slice %8 {offsets = [0, 40], sizes = [64, 8], strides = [1, 1]} : vector<64x96xbf16> to vector<64x8xbf16>
    %26 = vector.extract_strided_slice %8 {offsets = [0, 72], sizes = [64, 8], strides = [1, 1]} : vector<64x96xbf16> to vector<64x8xbf16>
    %cst_10 = arith.constant dense<0.000000e+00> : vector<64x64xf32>
    %27 = tpu.matmul %24, %25, %cst_10 {dimension_numbers = #tpu.dot_dimension_numbers<[1], [1], [0], [0], [0, 0, 1, 0], [], []>} : vector<64x8xbf16>, vector<64x8xbf16>, vector<64x64xf32> -> vector<64x64xf32>
    %cst_11 = arith.constant dense<0xFF800000> : vector<64xf32>
    %28 = vector.multi_reduction <maximumf>, %27, %cst_11 [1] : vector<64x64xf32> to vector<64xf32>
    %29 = vector.shape_cast %28 : vector<64xf32> to vector<64x1xf32>
    %30 = vector.broadcast %29 : vector<64x1xf32> to vector<64x64xf32>
    %31 = arith.subf %27, %30 : vector<64x64xf32>
    %32 = math.exp %31 : vector<64x64xf32>
    %cst_12 = arith.constant dense<0.000000e+00> : vector<64xf32>
    %33 = vector.multi_reduction <add>, %32, %cst_12 [1] : vector<64x64xf32> to vector<64xf32>
    %34 = vector.shape_cast %33 : vector<64xf32> to vector<64x1xf32>
    %35 = vector.broadcast %34 : vector<64x1xf32> to vector<64x64xf32>
    %36 = arith.divf %32, %35 : vector<64x64xf32>
    %37 = arith.truncf %36 : vector<64x64xf32> to vector<64x64xbf16>
    %cst_13 = arith.constant dense<0.000000e+00> : vector<64x8xf32>
    %38 = tpu.matmul %37, %26, %cst_13 {dimension_numbers = #tpu.dot_dimension_numbers<[1], [0], [0], [1], [0, 0, 1, 1], [], []>} : vector<64x64xbf16>, vector<64x8xbf16>, vector<64x8xf32> -> vector<64x8xf32>
    %39 = vector.extract_strided_slice %8 {offsets = [0, 16], sizes = [64, 8], strides = [1, 1]} : vector<64x96xbf16> to vector<64x8xbf16>
    %40 = vector.extract_strided_slice %8 {offsets = [0, 48], sizes = [64, 8], strides = [1, 1]} : vector<64x96xbf16> to vector<64x8xbf16>
    %41 = vector.extract_strided_slice %8 {offsets = [0, 80], sizes = [64, 8], strides = [1, 1]} : vector<64x96xbf16> to vector<64x8xbf16>
    %cst_14 = arith.constant dense<0.000000e+00> : vector<64x64xf32>
    %42 = tpu.matmul %39, %40, %cst_14 {dimension_numbers = #tpu.dot_dimension_numbers<[1], [1], [0], [0], [0, 0, 1, 0], [], []>} : vector<64x8xbf16>, vector<64x8xbf16>, vector<64x64xf32> -> vector<64x64xf32>
    %cst_15 = arith.constant dense<0xFF800000> : vector<64xf32>
    %43 = vector.multi_reduction <maximumf>, %42, %cst_15 [1] : vector<64x64xf32> to vector<64xf32>
    %44 = vector.shape_cast %43 : vector<64xf32> to vector<64x1xf32>
    %45 = vector.broadcast %44 : vector<64x1xf32> to vector<64x64xf32>
    %46 = arith.subf %42, %45 : vector<64x64xf32>
    %47 = math.exp %46 : vector<64x64xf32>
    %cst_16 = arith.constant dense<0.000000e+00> : vector<64xf32>
    %48 = vector.multi_reduction <add>, %47, %cst_16 [1] : vector<64x64xf32> to vector<64xf32>
    %49 = vector.shape_cast %48 : vector<64xf32> to vector<64x1xf32>
    %50 = vector.broadcast %49 : vector<64x1xf32> to vector<64x64xf32>
    %51 = arith.divf %47, %50 : vector<64x64xf32>
    %52 = arith.truncf %51 : vector<64x64xf32> to vector<64x64xbf16>
    %cst_17 = arith.constant dense<0.000000e+00> : vector<64x8xf32>
    %53 = tpu.matmul %52, %41, %cst_17 {dimension_numbers = #tpu.dot_dimension_numbers<[1], [0], [0], [1], [0, 0, 1, 1], [], []>} : vector<64x64xbf16>, vector<64x8xbf16>, vector<64x8xf32> -> vector<64x8xf32>
    %54 = vector.extract_strided_slice %8 {offsets = [0, 24], sizes = [64, 8], strides = [1, 1]} : vector<64x96xbf16> to vector<64x8xbf16>
    %55 = vector.extract_strided_slice %8 {offsets = [0, 56], sizes = [64, 8], strides = [1, 1]} : vector<64x96xbf16> to vector<64x8xbf16>
    %56 = vector.extract_strided_slice %8 {offsets = [0, 88], sizes = [64, 8], strides = [1, 1]} : vector<64x96xbf16> to vector<64x8xbf16>
    %cst_18 = arith.constant dense<0.000000e+00> : vector<64x64xf32>
    %57 = tpu.matmul %54, %55, %cst_18 {dimension_numbers = #tpu.dot_dimension_numbers<[1], [1], [0], [0], [0, 0, 1, 0], [], []>} : vector<64x8xbf16>, vector<64x8xbf16>, vector<64x64xf32> -> vector<64x64xf32>
    %cst_19 = arith.constant dense<0xFF800000> : vector<64xf32>
    %58 = vector.multi_reduction <maximumf>, %57, %cst_19 [1] : vector<64x64xf32> to vector<64xf32>
    %59 = vector.shape_cast %58 : vector<64xf32> to vector<64x1xf32>
    %60 = vector.broadcast %59 : vector<64x1xf32> to vector<64x64xf32>
    %61 = arith.subf %57, %60 : vector<64x64xf32>
    %62 = math.exp %61 : vector<64x64xf32>
    %cst_20 = arith.constant dense<0.000000e+00> : vector<64xf32>
    %63 = vector.multi_reduction <add>, %62, %cst_20 [1] : vector<64x64xf32> to vector<64xf32>
    %64 = vector.shape_cast %63 : vector<64xf32> to vector<64x1xf32>
    %65 = vector.broadcast %64 : vector<64x1xf32> to vector<64x64xf32>
    %66 = arith.divf %62, %65 : vector<64x64xf32>
    %67 = arith.truncf %66 : vector<64x64xf32> to vector<64x64xbf16>
    %cst_21 = arith.constant dense<0.000000e+00> : vector<64x8xf32>
    %68 = tpu.matmul %67, %56, %cst_21 {dimension_numbers = #tpu.dot_dimension_numbers<[1], [0], [0], [1], [0, 0, 1, 1], [], []>} : vector<64x64xbf16>, vector<64x8xbf16>, vector<64x8xf32> -> vector<64x8xf32>
    %69 = tpu.concatenate %23, %38, %53, %68 in 1 : vector<64x8xf32>, vector<64x8xf32>, vector<64x8xf32>, vector<64x8xf32> -> vector<64x32xf32>
    %70 = arith.truncf %69 : vector<64x32xf32> to vector<64x32xbf16>
    %c0_22 = arith.constant 0 : index
    %c0_23 = arith.constant 0 : index
    %71 = vector.load %arg4[%c0_22, %c0_23] : memref<32x32xbf16, #tpu.memory_space<vmem>>, vector<32x32xbf16>
    %cst_24 = arith.constant dense<0.000000e+00> : vector<64x32xf32>
    %72 = tpu.matmul %70, %71, %cst_24 {dimension_numbers = #tpu.dot_dimension_numbers<[1], [0], [0], [1], [0, 0, 1, 1], [], []>} : vector<64x32xbf16>, vector<32x32xbf16>, vector<64x32xf32> -> vector<64x32xf32>
    %c0_25 = arith.constant 0 : index
    %c0_26 = arith.constant 0 : index
    %73 = vector.load %arg5[%c0_25, %c0_26] : memref<1x32xf32, #tpu.memory_space<vmem>>, vector<1x32xf32>
    %74 = vector.broadcast %73 : vector<1x32xf32> to vector<64x32xf32>
    %75 = arith.addf %72, %74 : vector<64x32xf32>
    %c0_27 = arith.constant 0 : index
    %c0_28 = arith.constant 0 : index
    %c0_29 = arith.constant 0 : index
    %76 = vector.load %arg6[%c0_27, %c0_28, %c0_29] : memref<1x64x32xf32, #tpu.memory_space<vmem>>, vector<1x64x32xf32>
    %77 = vector.shape_cast %76 : vector<1x64x32xf32> to vector<64x32xf32>
    %78 = vector.shape_cast %75 : vector<64x32xf32> to vector<1x64x32xf32>
    tpu.vector_store %arg6[%c0_27, %c0_28, %c0_29], %78 {strides = array<i32>} : memref<1x64x32xf32, #tpu.memory_space<vmem>>, vector<1x64x32xf32>,
    return
  }
  func.func @transform_0(%arg0: i32) -> (i32, i32, i32) {
    %c0_i32 = arith.constant 0 : i32
    %c0_i32_0 = arith.constant 0 : i32
    %c0_i32_1 = arith.constant 0 : i32
    return %arg0, %c0_i32, %c0_i32_0 : i32, i32, i32
  }
  func.func @transform_1(%arg0: i32) -> (i32, i32) {
    %c0_i32 = arith.constant 0 : i32
    %c0_i32_0 = arith.constant 0 : i32
    %c0_i32_1 = arith.constant 0 : i32
    return %c0_i32, %c0_i32_0 : i32, i32
  }
  func.func @transform_2(%arg0: i32) -> (i32, i32) {
    %c0_i32 = arith.constant 0 : i32
    %c0_i32_0 = arith.constant 0 : i32
    %c0_i32_1 = arith.constant 0 : i32
    return %c0_i32, %c0_i32_0 : i32, i32
  }
  func.func @transform_3(%arg0: i32) -> (i32, i32) {
    %c0_i32 = arith.constant 0 : i32
    %c0_i32_0 = arith.constant 0 : i32
    %c0_i32_1 = arith.constant 0 : i32
    return %c0_i32, %c0_i32_0 : i32, i32
  }
  func.func @transform_4(%arg0: i32) -> (i32, i32) {
    %c0_i32 = arith.constant 0 : i32
    %c0_i32_0 = arith.constant 0 : i32
    %c0_i32_1 = arith.constant 0 : i32
    return %c0_i32, %c0_i32_0 : i32, i32
  }
  func.func @transform_5(%arg0: i32) -> (i32, i32, i32) {
    %c0_i32 = arith.constant 0 : i32
    %c0_i32_0 = arith.constant 0 : i32
    %c0_i32_1 = arith.constant 0 : i32
    return %arg0, %c0_i32, %c0_i32_0 : i32, i32, i32
  }
}

</mosaic_0001>

<bundles_post_ra>
// kernel: vanilla_attention_forward.1
= control target key start
LH: loop header
LB: loop body
LE: loop exit
PB: predicated region body
PF: predicated region fallthrough
CT: control target
= control target key end

     0   :  { %s2191_s18 = smov 0   ;;  %s2992_s0 = inlined_call_operand.vmem [shape: f32[2,64,32], index: 0, kind: input, shape index: {}]   ;;  %s2993_s1 = inlined_call_operand.vmem [shape: bf16[32,96], index: 1, kind: input, shape index: {}]   ;;  %s2994_s2 = inlined_call_operand.vmem [shape: f32[1,96], index: 2, kind: input, shape index: {}]   ;;  %s2995_s3 = inlined_call_operand.vmem [shape: bf16[32,32], index: 3, kind: input, shape index: {}]   ;;  %s2996_s4 = inlined_call_operand.vmem [shape: f32[1,32], index: 4, kind: input, shape index: {}]   ;;  %s2997_s5 = inlined_call_operand.vmem [shape: f32[2,64,32], index: 5, kind: output, shape index: {}]  }
   0x1 LB: > { %s1844_s19 = sadd.s32 4294967295, %s2145_s18   ;;  %p1848_p0 = scmp.ge.s32.totalorder %s2145_s18, 1  ;;  %s2145_s18 = sphi %s2191_s18, %s15_s18  }
   0x2   : > { %p187_p1 = scmp.lt.s32.totalorder %s2145_s18, 3 }
   0x4   : > { %p188_p2 = pnand %p1848_p0, %p187_p1 }
   0x5   : > { %p215_p3 = scmp.lt.s32.totalorder (!%p188_p2), %s1844_s19, 1  ;;  %s2147_s30 = smov (!%p188_p2), 88  }
   0x6   : > { %191 = sbr.rel (%p188_p2) target bundleno = 1772 (0x6ec), region = 40  ;;  %s2148_s6 = smov (!%p188_p2), 96  }
   0x7   : > { %s2149_s7 = smov (!%p188_p2), 64   ;;  %s2150_s8 = smov (!%p188_p2), 120  }
   0x8   : > { %s2151_s9 = smov (!%p188_p2), 72   ;;  %s2152_s10 = smov (!%p188_p2), 80  }
   0x9   : > { %s2153_s11 = smov (!%p188_p2), 112   ;;  %s2154_s12 = smov (!%p188_p2), 104  }
   0xa   : > { %s2155_s13 = smov (!%p188_p2), 56   ;;  %s2156_s14 = smov (!%p188_p2), 48  }
   0xb   : > { %v1914_v0 = vld [vmem:[%s2993_s1 + $0x8] sm:$0xff]  ;;  %v1913_v1 = vld [vmem:[%s2993_s1] sm:$0xff]  ;;  %s3011_s19 = smov (!%p215_p3, %s1844_s19), 1  ;;  %vm258_vm0 = vcmask 261120   ;;  %vm336_vm1 = vcmask 64512   ;;  %vm390_vm2 = vcmask 523264  }
   0xc   : > { %1917 = vmatpush.bf16.msra.mxu3 %v1914_v0  ;;  %277 = vmatpush.bf16.msra.mxu0 %v1914_v0  ;;  %s1911_s24 = sshll.u32 %s3011_s19, 6  ;;  %v2009_v16 = vld [vmem:[%s2994_s2] ss:$0 sm:$0xff]  ;;  %s2157_s15 = smov 40  }
   0xd   : > { %s219_s27 = scalar_lea.vmem %s2992_s0, %s1911_s24  ;;  %s2158_s16 = smov 8  }
   0xe   : > { %v228_v2 = vld [vmem:[%s219_s27 + $0x10] sm:$0xff]  ;;  %v229_v3 = vld [vmem:[%s219_s27 + $0x18] sm:$0xff]  ;;  %v226_v4 = vld [vmem:[%s219_s27] sm:$0xff]  ;;  %s2159_s17 = smov 24   ;;  %s2160_s20 = smov 16  }
   0xf   : > { %v235_v5 = vpack.c.bf16 %v229_v3, %v228_v2  ;;  %v227_v6 = vld [vmem:[%s219_s27 + $0x8] sm:$0xff]  ;;  %v230_v8 = vld [vmem:[%s219_s27 + $0x20] sm:$0xff]  ;;  %v232_v11 = vld [vmem:[%s219_s27 + $0x30] sm:$0xff] }
  0x10   : > { %1918 = vmatpush.bf16.msra.mxu3 %v1913_v1  ;;  %278 = vmatpush.bf16.msra.mxu0 %v1913_v1  ;;  %v234_v7 = vpack.c.bf16 %v227_v6, %v226_v4  ;;  %v231_v9 = vld [vmem:[%s219_s27 + $0x28] sm:$0xff]  ;;  %v233_v12 = vld [vmem:[%s219_s27 + $0x38] sm:$0xff] }
  0x11   : > { %v236_v10 = vpack.c.bf16 %v231_v9, %v230_v8  ;;  %v237_v13 = vpack.c.bf16 %v233_v12, %v232_v11 }
  0x13   : > { %1862 = vmatmul.msk.bf16.vlgmr.msra.gmra.mxu3 %vm258_vm0, %v235_v5  ;;  %1861 = vmatmul.msk.bf16.vlgmr.msra.gmra.mxu0 %vm258_vm0, %v234_v7 }
  0x23   : > { %1863 = vmatmul.msk.bf16.gmra.mxu3 %vm258_vm0, %v236_v10 }
  0x33   : > { %1864 = vmatmul.msk.bf16.gmra.mxu3 %vm258_vm0, %v237_v13 }
  0x90   : > { %v280_v14 = vpop.f32.mrf.mxu0 }
  0x91   : > { %v281_v21 = vadd.f32 %v2009_v16, %v280_v14 }
  0x93   : > { %v300_v26 = vpack.c.bf16 %v281_v21, %v281_v21 }
  0x95   : > { %v316_v31 = vunpack.c.l.b16 %v300_v26 }
  0x96   : > { %v285_v15 = vpop.f32.mrf.mxu3 }
  0x97   : > { %v286_v17 = vadd.f32 %v2009_v16, %v285_v15 }
  0x98   : > { %v282_v18 = vpop.f32.mrf.mxu0 }
  0x99   : > { %v302_v20 = vpack.c.bf16 %v286_v17, %v286_v17  ;;  %v283_v23 = vadd.f32 %v2009_v16, %v282_v18 }
  0x9b   : > { %v318_v25 = vunpack.c.l.b16 %v302_v20  ;;  %v301_v28 = vpack.c.bf16 %v283_v23, %v283_v23 }
  0x9d   : > { %v317_v32 = vunpack.c.l.b16 %v301_v28 }
  0x9e   : > { %v287_v19 = vpop.f32.mrf.mxu3 }
  0x9f   : > { %v288_v22 = vadd.f32 %v2009_v16, %v287_v19  ;;  %v2226_v33 = vpack.c.b16 %v317_v32, %v316_v31 }
  0xa1   : > { %v303_v24 = vpack.c.bf16 %v288_v22, %v288_v22 }
  0xa3   : > { %v319_v27 = vunpack.c.l.b16 %v303_v24 }
  0xa5   : > { %v2220_v29 = vpack.c.b16 %v319_v27, %v318_v25 }
  0xa6   : > { %v290_v30 = vpop.f32.mrf.mxu3 }
  0xa7   : > { %650 = vrot.lane.b32.xlu2 %v2220_v29, %s2147_s30  ;;  %330 = vrot.lane.b32.xlu1 %v2220_v29, %s2148_s6  ;;  %v291_v34 = vadd.f32 %v2009_v16, %v290_v30 }
  0xa9   : > { %v304_v36 = vpack.c.bf16 %v291_v34, %v291_v34 }
  0xab   : > { %v320_v39 = vunpack.c.l.b16 %v304_v36 }
  0xae   : > { %v292_v35 = vpop.f32.mrf.mxu3 }
  0xaf   : > { %v293_v37 = vadd.f32 %v2009_v16, %v292_v35  ;;  %328 = vrot.lane.b32.xlu1 %v2226_v33, %s2148_s6 }
  0xb1   : > { %v305_v38 = vpack.c.bf16 %v293_v37, %v293_v37 }
  0xb3   : > { %v321_v40 = vunpack.c.l.b16 %v305_v38 }
  0xb5   : > { %v2230_v41 = vpack.c.b16 %v321_v40, %v320_v39 }
  0xb6   : > { %v295_v42 = vpop.f32.mrf.mxu3 }
  0xb7   : > { %591 = vrot.lane.b32.xlu2 %v2230_v41, %s2149_s7  ;;  %642 = vrot.lane.b32.xlu1 %v2220_v29, %s2150_s8  ;;  %v296_v43 = vadd.f32 %v2009_v16, %v295_v42 }
  0xb9   : > { %v306_v45 = vpack.c.bf16 %v296_v43, %v296_v43 }
  0xbb   : > { %v322_v48 = vunpack.c.l.b16 %v306_v45 }
  0xbe   : > { %v297_v44 = vpop.f32.mrf.mxu3 }
  0xbf   : > { %v298_v46 = vadd.f32 %v2009_v16, %v297_v44  ;;  %587 = vrot.lane.b32.xlu2 %v2226_v33, %s2149_s7  ;;  %1286 = vrot.lane.b32.xlu1 %v2220_v29, %s2151_s9 }
  0xc1   : > { %v307_v47 = vpack.c.bf16 %v298_v46, %v298_v46 }
  0xc3   : > { %v323_v49 = vunpack.c.l.b16 %v307_v47 }
  0xc5   : > { %v2239_v50 = vpack.c.b16 %v323_v49, %v322_v48 }
  0xc7   : > { %334 = vrot.lane.b32.xlu0 %v2239_v50, %s2148_s6  ;;  %644 = vrot.lane.b32.xlu2 %v2230_v41, %s2150_s8 }
  0xc8   : > { %1284 = vrot.lane.b32.xlu1 %v2226_v33, %s2151_s9 }
  0xcf   : > { %332 = vrot.lane.b32.xlu0 %v2230_v41, %s2148_s6  ;;  %970 = vrot.lane.b32.xlu2 %v2230_v41, %s2152_s10 }
  0xd0   : > { %960 = vrot.lane.b32.xlu1 %v2220_v29, %s2153_s11 }
  0xd7   : > { %652 = vrot.lane.b32.xlu0 %v2230_v41, %s2147_s30  ;;  %1288 = vrot.lane.b32.xlu2 %v2230_v41, %s2151_s9 }
  0xd8   : > { %593 = vrot.lane.b32.xlu1 %v2239_v50, %s2149_s7 }
  0xdf   : > { %966 = vrot.lane.b32.xlu2 %v2226_v33, %s2152_s10  ;;  %648 = vrot.lane.b32.xlu0 %v2226_v33, %s2147_s30 }
  0xe0   : > { %1290 = vrot.lane.b32.xlu1 %v2239_v50, %s2151_s9 }
  0xe7   : > { %958 = vrot.lane.b32.xlu2 %v2226_v33, %s2153_s11  ;;  %640 = vrot.lane.b32.xlu0 %v2226_v33, %s2150_s8 }
  0xef   : > { %1278 = vrot.lane.b32.xlu2 %v2220_v29, %s2154_s12  ;;  %589 = vrot.lane.b32.xlu0 %v2220_v29, %s2149_s7 }
  0xf7   : > { %972 = vrot.lane.b32.xlu2 %v2239_v50, %s2152_s10  ;;  %968 = vrot.lane.b32.xlu0 %v2220_v29, %s2152_s10 }
  0xff   : > { %646 = vrot.lane.b32.xlu2 %v2239_v50, %s2150_s8  ;;  %1276 = vrot.lane.b32.xlu0 %v2226_v33, %s2154_s12 }
 0x101   : > { %v2276_v51 = vpop.permute.xlu2 %650 }
 0x102   : > { %v672_v24 = vsel %vm336_vm1, %v2276_v51, 0 }
 0x107   : > { %962 = vrot.lane.b32.xlu0 %v2230_v41, %s2153_s11 }
 0x10f   : > { %654 = vrot.lane.b32.xlu0 %v2239_v50, %s2147_s30  ;;  %s224_s30 = scalar_lea.vmem %s2997_s5, %s1911_s24 }
 0x111   : > { %v592_v52 = vpop.permute.xlu2 %591 }
 0x119   : > { %v331_v53 = vpop.permute.xlu1 %330  ;;  %v588_v54 = vpop.permute.xlu2 %587 }
 0x11a   : > { %v353_v6 = vsel %vm336_vm1, %v331_v53, 0 }
 0x121   : > { %v329_v55 = vpop.permute.xlu1 %328  ;;  %v2280_v56 = vpop.permute.xlu2 %644 }
 0x122   : > { %v350_v9 = vsel %vm336_vm1, %v329_v55, 0 }
 0x129   : > { %v2282_v57 = vpop.permute.xlu1 %642  ;;  %v971_v59 = vpop.permute.xlu2 %970 }
 0x12a   : > { %v993_v16 = vsel %vm336_vm1, %v971_v59, 0 }
 0x131   : > { %v2284_v58 = vpop.permute.xlu1 %1286  ;;  %v1289_v63 = vpop.permute.xlu2 %1288 }
 0x132   : > { %v1311_v28 = vsel %vm336_vm1, %v1289_v63, 0  ;;  %v1308_v30 = vsel %vm336_vm1, %v2284_v58, 0 }
 0x139   : > { %v335_v60 = vpop.permute.xlu0 %334  ;;  %v967_v3 = vpop.permute.xlu2 %966 }
 0x13a   : > { %v2286_v61 = vpop.permute.xlu1 %1284  ;;  %v359_v62 = vsel %vm336_vm1, %v335_v60, 0  ;;  %v987_v20 = vsel %vm336_vm1, %v967_v3, 0 }
 0x13b   : > { %365 = vmatpush.bf16.xpose.msra.mxu1 %v359_v62  ;;  %v1305_v31 = vsel %vm336_vm1, %v2286_v61, 0 }
 0x141   : > { %v333_v0 = vpop.permute.xlu0 %332  ;;  %v2293_v7 = vpop.permute.xlu2 %958 }
 0x142   : > { %v2289_v1 = vpop.permute.xlu1 %960  ;;  %v356_v2 = vsel %vm336_vm1, %v333_v0, 0 }
 0x143   : > { %366 = vmatpush.bf16.xpose.msra.mxu1 %v356_v2 }
 0x149   : > { %v653_v4 = vpop.permute.xlu0 %652  ;;  %v1279_v11 = vpop.permute.xlu2 %1278 }
 0x14a   : > { %v594_v5 = vpop.permute.xlu1 %593  ;;  %v675_v23 = vsel %vm336_vm1, %v653_v4, 0 }
 0x14b   : > { %615 = vmatpush.bf16.msrb.mxu0 %v594_v5  ;;  %1920 = vmatpush.bf16.msra.mxu2 %v594_v5 }
 0x14c   : > { %367 = vmatpush.bf16.xpose.msra.mxu1 %v353_v6 }
 0x14f   : > { %616 = vmatpush.bf16.msrb.mxu0 %v592_v52  ;;  %1922 = vmatpush.bf16.msra.mxu2 %v592_v52 }
 0x151   : > { %v649_v8 = vpop.permute.xlu0 %648  ;;  %v973_v13 = vpop.permute.xlu2 %972 }
 0x152   : > { %v996_v14 = vsel %vm336_vm1, %v973_v13, 0  ;;  %v1291_v25 = vpop.permute.xlu1 %1290  ;;  %v669_v26 = vsel %vm336_vm1, %v649_v8, 0 }
 0x153   : > { %v1314_v27 = vsel %vm336_vm1, %v1291_v25, 0 }
 0x154   : > { %368 = vmatpush.bf16.xpose.msra.mxu1 %v350_v9 }
 0x159   : > { %v641_v10 = vpop.permute.xlu0 %640  ;;  %v647_v32 = vpop.permute.xlu2 %646 }
 0x15b   : > { %1865 = vmatmul.msk.bf16.vlgmr.msra.gmra.mxu1 %vm336_vm1, %v2226_v33 }
 0x15c   : > { %1919 = vmatpush.bf16.msrb.mxu1 %v594_v5 }
 0x160   : > { %1921 = vmatpush.bf16.msrb.mxu1 %v592_v52 }
 0x161   : > { %v590_v12 = vpop.permute.xlu0 %589 }
 0x162   : > { %617 = vmatpush.bf16.msrb.mxu0 %v590_v12  ;;  %1924 = vmatpush.bf16.msra.mxu2 %v590_v12 }
 0x164   : > { %1923 = vmatpush.bf16.msrb.mxu1 %v590_v12 }
 0x166   : > { %618 = vmatpush.bf16.msrb.mxu0 %v588_v54  ;;  %1926 = vmatpush.bf16.msra.mxu2 %v588_v54 }
 0x168   : > { %1925 = vmatpush.bf16.msrb.mxu1 %v588_v54 }
 0x169   : > { %v969_v15 = vpop.permute.xlu0 %968 }
 0x16a   : > { %1002 = vmatpush.bf16.xpose.msrb.mxu2 %v996_v14  ;;  %v990_v18 = vsel %vm336_vm1, %v969_v15, 0 }
 0x16b   : > { %1866 = vmatmul.msk.bf16.gmra.mxu1 %vm336_vm1, %v2220_v29 }
 0x171   : > { %v1277_v17 = vpop.permute.xlu0 %1276 }
 0x172   : > { %1003 = vmatpush.bf16.xpose.msrb.mxu2 %v993_v16 }
 0x179   : > { %v2303_v19 = vpop.permute.xlu0 %962 }
 0x17a   : > { %1004 = vmatpush.bf16.xpose.msrb.mxu2 %v990_v18 }
 0x17b   : > { %1867 = vmatmul.msk.bf16.gmra.mxu1 %vm336_vm1, %v2230_v41 }
 0x181   : > { %v655_v21 = vpop.permute.xlu0 %654 }
 0x182   : > { %1005 = vmatpush.bf16.xpose.msrb.mxu2 %v987_v20  ;;  %v678_v22 = vsel %vm336_vm1, %v655_v21, 0 }
 0x183   : > { %684 = vmatpush.bf16.xpose.msrb.mxu3 %v678_v22 }
 0x18b   : > { %1868 = vmatmul.msk.bf16.gmra.mxu1 %vm336_vm1, %v2239_v50  ;;  %685 = vmatpush.bf16.xpose.msrb.mxu3 %v675_v23 }
 0x193   : > { %686 = vmatpush.bf16.xpose.msrb.mxu3 %v672_v24 }
 0x19b   : > { %687 = vmatpush.bf16.xpose.msrb.mxu3 %v669_v26 }
 0x1a2   : > { %1873 = vmatmul.msk.bf16.vlgmr.msrb.gmra.mxu3 %vm336_vm1, %v641_v10 }
 0x1a3   : > { %1320 = vmatpush.bf16.xpose.msra.mxu3 %v1314_v27 }
 0x1ab   : > { %1321 = vmatpush.bf16.xpose.msra.mxu3 %v1311_v28 }
 0x1b2   : > { %1874 = vmatmul.msk.bf16.gmra.mxu3 %vm336_vm1, %v2282_v57 }
 0x1b3   : > { %1322 = vmatpush.bf16.xpose.msra.mxu3 %v1308_v30 }
 0x1bb   : > { %1323 = vmatpush.bf16.xpose.msra.mxu3 %v1305_v31 }
 0x1c2   : > { %1875 = vmatmul.msk.bf16.gmra.mxu3 %vm336_vm1, %v2280_v56 }
 0x1d2   : > { %1876 = vmatmul.msk.bf16.gmra.mxu3 %vm336_vm1, %v647_v32 }
 0x1d8   : > { %v2327_v34 = vpop.f32.mrf.mxu1 }
 0x1d9   : > { %v391_v8 = vsel %vm390_vm2, %v2327_v34, -inf }
 0x1e0   : > { %v2329_v35 = vpop.f32.mrf.mxu1 }
 0x1e1   : > { %v394_v4 = vsel %vm390_vm2, %v2329_v35, -inf }
 0x1e2   : > { %1889 = vmatmul.msk.bf16.vlgmr.msra.gmra.mxu3 %vm336_vm1, %v1277_v17 }
 0x1e8   : > { %v2332_v36 = vpop.f32.mrf.mxu1 }
 0x1e9   : > { %v397_v14 = vsel %vm390_vm2, %v2332_v36, -inf }
 0x1f0   : > { %v2334_v37 = vpop.f32.mrf.mxu1 }
 0x1f2   : > { %1890 = vmatmul.msk.bf16.gmra.mxu3 %vm336_vm1, %v1279_v11 }
 0x1f8   : > { %v380_v38 = vpop.f32.mrf.mxu1 }
 0x1f9   : > { %v403_v39 = vsel %vm390_vm2, %v380_v38, -inf }
 0x1fa   : > { %404 = vmax.xlane.f32.xlu2 %v403_v39 }
 0x200   : > { %v382_v40 = vpop.f32.mrf.mxu1 }
 0x201   : > { %v406_v42 = vsel %vm390_vm2, %v382_v40, -inf }
 0x202   : > { %407 = vmax.xlane.f32.xlu2 %v406_v42 }
 0x208   : > { %v385_v43 = vpop.f32.mrf.mxu1 }
 0x209   : > { %v409_v44 = vsel %vm390_vm2, %v385_v43, -inf }
 0x20a   : > { %410 = vmax.xlane.f32.xlu1 %v409_v44 }
 0x210   : > { %v387_v45 = vpop.f32.mrf.mxu1 }
 0x211   : > { %v412_v46 = vsel %vm390_vm2, %v387_v45, -inf }
 0x212   : > { %413 = vmax.xlane.f32.xlu2 %v412_v46 }
 0x223   : > { %1280 = vrot.lane.b32.xlu1 %v2230_v41, %s2154_s12 }
 0x225   : > { %v2345_v47 = vpop.f32.mrf.mxu3 }
 0x226   : > { %v709_v24 = vsel %vm390_vm2, %v2345_v47, -inf }
 0x22a   : > { %964 = vrot.lane.b32.xlu2 %v2239_v50, %s2153_s11 }
 0x22d   : > { %v2347_v48 = vpop.f32.mrf.mxu3 }
 0x22e   : > { %v712_v12 = vsel %vm390_vm2, %v2347_v48, -inf }
 0x235   : > { %v2349_v53 = vpop.f32.mrf.mxu3 }
 0x236   : > { %v715_v6 = vsel %vm390_vm2, %v2349_v53, -inf }
 0x23d   : > { %v2355_v60 = vpop.f32.mrf.mxu3 }
 0x23e   : > { %v718_v25 = vsel %vm390_vm2, %v2355_v60, -inf }
 0x245   : > { %v2363_v3 = vpop.f32.mrf.mxu3 }
 0x246   : > { %v721_v15 = vsel %vm390_vm2, %v2363_v3, -inf }
 0x24d   : > { %v2375_v9 = vpop.f32.mrf.mxu3 }
 0x24e   : > { %v724_v11 = vsel %vm390_vm2, %v2375_v9, -inf }
 0x255   : > { %v2382_v13 = vpop.f32.mrf.mxu3 }
 0x25d   : > { %v2388_v17 = vpop.f32.mrf.mxu3 }
 0x25e   : > { %v730_v20 = vsel %vm390_vm2, %v2388_v17, -inf }
 0x26d   : > { %v405_v49 = vpop.xlane.xlu2 %404 }
 0x26e   : > { %v419_v51 = vsub.f32 %v380_v38, %v405_v49 }
 0x270   : > { %v431_v52 = vmul.f32 1.442695, %v419_v51 }
 0x272   : > { %2011 = vpow2.f32 %v431_v52 }
 0x275   : > { %v408_v54 = vpop.xlane.xlu2 %407 }
 0x276   : > { %v420_v55 = vsub.f32 %v382_v40, %v408_v54 }
 0x278   : > { %v2351_v56 = vpop.eup %2011  ;;  %v433_v57 = vmul.f32 1.442695, %v420_v55 }
 0x279   : > { %v451_v58 = vsel %vm390_vm2, %v2351_v56, 0.0 }
 0x27a   : > { %2013 = vpow2.f32 %v433_v57  ;;  %452 = vadd.xlane.f32.xlu0 %v451_v58 }
 0x27d   : > { %v411_v59 = vpop.xlane.xlu1 %410 }
 0x27e   : > { %v421_v61 = vsub.f32 %v385_v43, %v411_v59 }
 0x280   : > { %v2357_v62 = vpop.eup %2013  ;;  %v435_v63 = vmul.f32 1.442695, %v421_v61 }
 0x281   : > { %v454_v0 = vsel %vm390_vm2, %v2357_v62, 0.0 }
 0x282   : > { %2015 = vpow2.f32 %v435_v63  ;;  %455 = vadd.xlane.f32.xlu2 %v454_v0 }
 0x285   : > { %v414_v16 = vpop.xlane.xlu2 %413 }
 0x286   : > { %v422_v18 = vsub.f32 %v387_v45, %v414_v16 }
 0x288   : > { %v2361_v2 = vpop.eup %2015  ;;  %v437_v21 = vmul.f32 1.442695, %v422_v18 }
 0x289   : > { %v457_v5 = vsel %vm390_vm2, %v2361_v2, 0.0 }
 0x28a   : > { %395 = vmax.xlane.f32.xlu2 %v394_v4  ;;  %458 = vadd.xlane.f32.xlu1 %v457_v5  ;;  %2017 = vpow2.f32 %v437_v21 }
 0x28d   : > { %v2404_v26 = vpop.permute.xlu2 %964 }
 0x28e   : > { %1282 = vrot.lane.b32.xlu0 %v2239_v50, %s2154_s12 }
 0x290   : > { %v2392_v22 = vpop.eup %2017 }
 0x291   : > { %v460_v23 = vsel %vm390_vm2, %v2392_v22, 0.0 }
 0x292   : > { %716 = vmax.xlane.f32.xlu2 %v715_v6  ;;  %392 = vmax.xlane.f32.xlu1 %v391_v8 }
 0x295   : > { %v1281_v10 = vpop.permute.xlu1 %1280 }
 0x296   : > { %1891 = vmatmul.msk.bf16.gmra.mxu3 %vm336_vm1, %v1281_v10 }
 0x29a   : > { %725 = vmax.xlane.f32.xlu2 %v724_v11  ;;  %713 = vmax.xlane.f32.xlu1 %v712_v12 }
 0x2a2   : > { %398 = vmax.xlane.f32.xlu2 %v397_v14  ;;  %722 = vmax.xlane.f32.xlu1 %v721_v15 }
 0x2aa   : > { %731 = vmax.xlane.f32.xlu2 %v730_v20 }
 0x2b8   : > { %461 = vadd.xlane.f32.xlu0 %v460_v23 }
 0x2c0   : > { %710 = vmax.xlane.f32.xlu0 %v709_v24 }
 0x2c2   : > { %911 = vrot.lane.b32.xlu2 %v2239_v50, %s2155_s13 }
 0x2c8   : > { %719 = vmax.xlane.f32.xlu0 %v718_v25 }
 0x2ca   : > { %907 = vrot.lane.b32.xlu2 %v2220_v29, %s2155_s13 }
 0x2ed   : > { %v453_v27 = vpop.xlane.xlu0 %452 }
 0x2ee   : > { %2019 = vrcp.f32 %v453_v27  ;;  %v534_v45 = vand.u32 2147483648, %v453_v27  ;;  %vm528_vm4 = vweird.f32 %v453_v27  ;;  %v532_v49 = vand.u32 2147483647, %v453_v27 }
 0x2f0   : > { %v535_v63 = vor.u32 1.1754944e-38, %v534_v45  ;;  %vm533_vm7 = vcmp.eq.f32.partialorder %v532_v49, 8.507059e+37 }
 0x2f4   : > { %v2020_v28 = vpop.eup %2019 }
 0x2f5   : > { %v524_v30 = vmul.f32 %v2020_v28, %v453_v27  ;;  %v456_v31 = vpop.xlane.xlu2 %455  ;;  %vm529_vm3 = vweird.f32 %v2020_v28 }
 0x2f6   : > { %2021 = vrcp.f32 %v456_v31  ;;  %vm2409_vm5 = vmor %vm528_vm4, %vm529_vm3  ;;  %v549_v54 = vand.u32 2147483648, %v456_v31  ;;  %v547_v59 = vand.u32 2147483647, %v456_v31  ;;  %vm543_vm8 = vweird.f32 %v456_v31 }
 0x2f7   : > { %v525_v32 = vsub.f32 1.0, %v524_v30 }
 0x2f8   : > { %v550_v0 = vor.u32 1.1754944e-38, %v549_v54  ;;  %vm548_vm10 = vcmp.eq.f32.partialorder %v547_v59, 8.507059e+37 }
 0x2f9   : > { %v526_v38 = vmul.f32 %v2020_v28, %v525_v32 }
 0x2fb   : > { %v527_v40 = vadd.f32 %v2020_v28, %v526_v38 }
 0x2fc   : > { %v2022_v39 = vpop.eup %2021 }
 0x2fd   : > { %v539_v42 = vmul.f32 %v2022_v39, %v456_v31  ;;  %v396_v43 = vpop.xlane.xlu2 %395  ;;  %v2406_v44 = vpop.xlane.xlu1 %458  ;;  %vm544_vm6 = vweird.f32 %v2022_v39  ;;  %v531_v61 = vsel %vm2409_vm5, %v2020_v28, %v527_v40 }
 0x2fe   : > { %v416_v46 = vsub.f32 %v2329_v35, %v396_v43  ;;  %vm545_vm9 = vmor %vm543_vm8, %vm544_vm6  ;;  %v536_v4 = vsel %vm533_vm7, %v535_v63, %v531_v61  ;;  %v564_v59 = vand.u32 2147483648, %v2406_v44  ;;  %vm558_vm12 = vweird.f32 %v2406_v44 }
 0x2ff   : > { %v540_v51 = vsub.f32 1.0, %v539_v42  ;;  %v537_v12 = vmul.f32 %v2351_v56, %v536_v4  ;;  %v562_v63 = vand.u32 2147483647, %v2406_v44 }
 0x300   : > { %v425_v55 = vmul.f32 1.442695, %v416_v46  ;;  %v1283_v57 = vpop.permute.xlu0 %1282 }
 0x301   : > { %v541_v58 = vmul.f32 %v2022_v39, %v540_v51  ;;  %1892 = vmatmul.msk.bf16.gmra.mxu3 %vm336_vm1, %v1283_v57  ;;  %vm563_vm15 = vcmp.eq.f32.partialorder %v562_v63, 8.507059e+37 }
 0x302   : > { %2023 = vpow2.f32 %v425_v55 }
 0x303   : > { %v542_v35 = vadd.f32 %v2022_v39, %v541_v58 }
 0x305   : > { %v717_v5 = vpop.xlane.xlu2 %716  ;;  %v393_v6 = vpop.xlane.xlu1 %392  ;;  %v546_v8 = vsel %vm545_vm9, %v2022_v39, %v542_v35 }
 0x306   : > { %v415_v10 = vsub.f32 %v2327_v34, %v393_v6  ;;  %v551_v11 = vsel %vm548_vm10, %v550_v0, %v546_v8  ;;  %v735_v30 = vsub.f32 %v2349_v53, %v717_v5  ;;  %v2445_v39 = vpop.f32.mrf.mxu3 }
 0x307   : > { %v552_v14 = vmul.f32 %v2357_v62, %v551_v11  ;;  %v727_v62 = vsel %vm390_vm2, %v2382_v13, -inf  ;;  %v1345_v40 = vsel %vm390_vm2, %v2445_v39, -inf }
 0x308   : > { %v2419_v15 = vpop.eup %2023  ;;  %v423_v16 = vmul.f32 1.442695, %v415_v10  ;;  %v745_v32 = vmul.f32 1.442695, %v735_v30  ;;  %v565_v10 = vor.u32 1.1754944e-38, %v564_v59 }
 0x309   : > { %v442_v18 = vsel %vm390_vm2, %v2419_v15, 0.0  ;;  %v585_v20 = vpack.c.bf16 %v552_v14, %v537_v12 }
 0x30a   : > { %443 = vadd.xlane.f32.xlu1 %v442_v18  ;;  %2025 = vpow2.f32 %v423_v16 }
 0x30b   : > { %1871 = vmatmul.msk.bf16.vlgmr.msra.gmra.mxu2 %vm390_vm2, %v585_v20 }
 0x30d   : > { %v2424_v21 = vpop.xlane.xlu2 %725  ;;  %v714_v23 = vpop.xlane.xlu1 %713 }
 0x30e   : > { %v734_v34 = vsub.f32 %v2347_v48, %v714_v23  ;;  %v400_v48 = vsel %vm390_vm2, %v2334_v37, -inf  ;;  %v2465_v30 = vpop.f32.mrf.mxu3 }
 0x310   : > { %v743_v24 = vmul.f32 1.442695, %v734_v34  ;;  %v2427_v56 = vpop.eup %2025 }
 0x311   : > { %v439_v25 = vsel %vm390_vm2, %v2427_v56, 0.0 }
 0x312   : > { %728 = vmax.xlane.f32.xlu1 %v727_v62  ;;  %2027 = vpow2.f32 %v743_v24  ;;  %440 = vadd.xlane.f32.xlu0 %v439_v25 }
 0x313   : > { %2029 = vrcp.f32 %v2406_v44 }
 0x314   : > { %2031 = vpow2.f32 %v745_v32 }
 0x315   : > { %v2433_v27 = vpop.xlane.xlu2 %398 }
 0x318   : > { %v2435_v28 = vpop.eup %2027 }
 0x319   : > { %v760_v31 = vsel %vm390_vm2, %v2435_v28, 0.0  ;;  %v2030_v53 = vpop.eup %2029 }
 0x31a   : > { %401 = vmax.xlane.f32.xlu0 %v400_v48  ;;  %761 = vadd.xlane.f32.xlu1 %v760_v31  ;;  %v2449_v43 = vpop.eup %2031  ;;  %v554_v45 = vmul.f32 %v2030_v53, %v2406_v44  ;;  %vm559_vm11 = vweird.f32 %v2030_v53  ;;  %v723_v48 = vpop.xlane.xlu1 %722 }
 0x31b   : > { %v763_v46 = vsel %vm390_vm2, %v2449_v43, 0.0  ;;  %vm560_vm13 = vmor %vm558_vm12, %vm559_vm11  ;;  %v2475_v31 = vpop.f32.mrf.mxu3 }
 0x31c   : > { %v555_v49 = vsub.f32 1.0, %v554_v45  ;;  %v417_v45 = vsub.f32 %v2332_v36, %v2433_v27  ;;  %v738_v36 = vsub.f32 %v2375_v9, %v2424_v21 }
 0x31d   : > { %v2442_v38 = vpop.xlane.xlu2 %731 }
 0x31e   : > { %v556_v52 = vmul.f32 %v2030_v53, %v555_v49 }
 0x320   : > { %v557_v55 = vadd.f32 %v2030_v53, %v556_v52 }
 0x322   : > { %1346 = vmax.xlane.f32.xlu1 %v1345_v40  ;;  %v561_v8 = vsel %vm560_vm13, %v2030_v53, %v557_v55  ;;  %v1351_v40 = vsel %vm390_vm2, %v2475_v31, -inf  ;;  %v1348_v55 = vsel %vm390_vm2, %v2465_v30, -inf }
 0x325   : > { %v912_v42 = vpop.permute.xlu2 %911 }
 0x326   : > { %933 = vmatpush.bf16.msra.mxu0 %v912_v42  ;;  %v2483_v42 = vpop.f32.mrf.mxu3 }
 0x327   : > { %v1354_v9 = vsel %vm390_vm2, %v2483_v42, -inf }
 0x32a   : > { %764 = vadd.xlane.f32.xlu1 %v763_v46 }
 0x32b   : > { %v462_v51 = vpop.xlane.xlu0 %461 }
 0x32c   : > { %2033 = vrcp.f32 %v462_v51  ;;  %v579_v0 = vand.u32 2147483648, %v462_v51  ;;  %v577_v6 = vand.u32 2147483647, %v462_v51  ;;  %vm573_vm3 = vweird.f32 %v462_v51 }
 0x32e   : > { %v580_v12 = vor.u32 1.1754944e-38, %v579_v0  ;;  %vm578_vm5 = vcmp.eq.f32.partialorder %v577_v6, 8.507059e+37  ;;  %v2491_v46 = vpop.f32.mrf.mxu3 }
 0x32f   : > { %v1357_v49 = vsel %vm390_vm2, %v2491_v46, -inf }
 0x332   : > { %v2034_v54 = vpop.eup %2033 }
 0x333   : > { %v569_v57 = vmul.f32 %v2034_v54, %v462_v51  ;;  %v711_v58 = vpop.xlane.xlu0 %710  ;;  %vm574_vm14 = vweird.f32 %v2034_v54 }
 0x334   : > { %v733_v61 = vsub.f32 %v2345_v47, %v711_v58  ;;  %vm575_vm4 = vmor %vm573_vm3, %vm574_vm14  ;;  %v566_v47 = vsel %vm563_vm15, %v565_v10, %v561_v8 }
 0x335   : > { %v570_v35 = vsub.f32 1.0, %v569_v57  ;;  %v567_v20 = vmul.f32 %v2361_v2, %v566_v47  ;;  %v737_v2 = vsub.f32 %v2363_v3, %v723_v48 }
 0x336   : > { %v741_v4 = vmul.f32 1.442695, %v733_v61  ;;  %v2505_v27 = vpop.f32.mrf.mxu3 }
 0x337   : > { %v571_v5 = vmul.f32 %v2034_v54, %v570_v35  ;;  %v749_v32 = vmul.f32 1.442695, %v737_v2  ;;  %v1360_v48 = vsel %vm390_vm2, %v2505_v27, -inf }
 0x338   : > { %2035 = vpow2.f32 %v741_v4 }
 0x339   : > { %v572_v11 = vadd.f32 %v2034_v54, %v571_v5 }
 0x33b   : > { %v720_v14 = vpop.xlane.xlu0 %719  ;;  %v576_v16 = vsel %vm575_vm4, %v2034_v54, %v572_v11 }
 0x33c   : > { %v736_v44 = vsub.f32 %v2355_v60, %v720_v14  ;;  %v581_v18 = vsel %vm578_vm5, %v580_v12, %v576_v16 }
 0x33d   : > { %v582_v23 = vmul.f32 %v2392_v22, %v581_v18 }
 0x33e   : > { %v2461_v34 = vpop.eup %2035  ;;  %v747_v24 = vmul.f32 1.442695, %v736_v44 }
 0x33f   : > { %v757_v62 = vsel %vm390_vm2, %v2461_v34, 0.0  ;;  %v586_v25 = vpack.c.bf16 %v582_v23, %v567_v20 }
 0x340   : > { %2037 = vpow2.f32 %v747_v24  ;;  %758 = vadd.xlane.f32.xlu0 %v757_v62 }
 0x341   : > { %1872 = vmatmul.msk.bf16.gmra.mxu2 %vm390_vm2, %v586_v25  ;;  %2039 = vpow2.f32 %v749_v32 }
 0x343   : > { %905 = vrot.lane.b32.xlu1 %v2226_v33, %s2155_s13 }
 0x346   : > { %v2470_v60 = vpop.eup %2037 }
 0x347   : > { %v766_v22 = vsel %vm390_vm2, %v2470_v60, 0.0  ;;  %v2481_v53 = vpop.eup %2039 }
 0x348   : > { %767 = vadd.xlane.f32.xlu2 %v766_v22  ;;  %v769_v3 = vsel %vm390_vm2, %v2481_v53, 0.0 }
 0x350   : > { %1352 = vmax.xlane.f32.xlu2 %v1351_v40 }
 0x351   : > { %1881 = vmatmul.msk.bf16.vlgmr.msrb.gmra.mxu2 %vm336_vm1, %v2293_v7  ;;  %v427_v7 = vmul.f32 1.442695, %v417_v45 }
 0x353   : > { %2041 = vpow2.f32 %v427_v7 }
 0x354   : > { %909 = vrot.lane.b32.xlu0 %v2230_v41, %s2155_s13 }
 0x358   : > { %770 = vadd.xlane.f32.xlu2 %v769_v3 }
 0x359   : > { %v2497_v51 = vpop.eup %2041 }
 0x35a   : > { %v445_v52 = vsel %vm390_vm2, %v2497_v51, 0.0 }
 0x360   : > { %1358 = vmax.xlane.f32.xlu2 %v1357_v49 }
 0x361   : > { %1882 = vmatmul.msk.bf16.gmra.mxu2 %vm336_vm1, %v2289_v1  ;;  %v751_v1 = vmul.f32 1.442695, %v738_v36 }
 0x36d   : > { %446 = vadd.xlane.f32.xlu1 %v445_v52 }
 0x371   : > { %1883 = vmatmul.msk.bf16.gmra.mxu2 %vm336_vm1, %v2303_v19 }
 0x37d   : > { %v444_v54 = vpop.xlane.xlu1 %443 }
 0x37e   : > { %2043 = vrcp.f32 %v444_v54  ;;  %1349 = vmax.xlane.f32.xlu0 %v1348_v55  ;;  %v489_v11 = vand.u32 2147483648, %v444_v54  ;;  %vm483_vm7 = vweird.f32 %v444_v54  ;;  %v487_v47 = vand.u32 2147483647, %v444_v54 }
 0x37f   : > { %2045 = vpow2.f32 %v751_v1 }
 0x380   : > { %v490_v62 = vor.u32 1.1754944e-38, %v489_v11  ;;  %vm488_vm10 = vcmp.eq.f32.partialorder %v487_v47, 8.507059e+37 }
 0x381   : > { %1884 = vmatmul.msk.bf16.gmra.mxu2 %vm336_vm1, %v2404_v26 }
 0x384   : > { %v2044_v57 = vpop.eup %2043  ;;  %v2511_v58 = vpop.f32.mrf.mxu3 }
 0x385   : > { %v479_v19 = vmul.f32 %v2044_v57, %v444_v54  ;;  %v1363_v21 = vsel %vm390_vm2, %v2511_v58, -inf  ;;  %v441_v59 = vpop.xlane.xlu0 %440  ;;  %v729_v63 = vpop.xlane.xlu1 %728  ;;  %vm484_vm6 = vweird.f32 %v2044_v57 }
 0x386   : > { %1355 = vmax.xlane.f32.xlu0 %v1354_v9  ;;  %1364 = vmax.xlane.f32.xlu1 %v1363_v21  ;;  %2047 = vrcp.f32 %v441_v59  ;;  %v2517_v35 = vpop.eup %2045  ;;  %v739_v0 = vsub.f32 %v2382_v13, %v729_v63  ;;  %vm2523_vm8 = vmor %vm483_vm7, %vm484_vm6  ;;  %v474_v13 = vand.u32 2147483648, %v441_v59  ;;  %v472_v24 = vand.u32 2147483647, %v441_v59 }
 0x387   : > { %v480_v61 = vsub.f32 1.0, %v479_v19  ;;  %v772_v5 = vsel %vm390_vm2, %v2517_v35, 0.0  ;;  %vm468_vm11 = vweird.f32 %v441_v59  ;;  %v740_v21 = vsub.f32 %v2388_v17, %v2442_v38 }
 0x388   : > { %v753_v16 = vmul.f32 1.442695, %v739_v0  ;;  %v475_v25 = vor.u32 1.1754944e-38, %v474_v13  ;;  %vm473_vm13 = vcmp.eq.f32.partialorder %v472_v24, 8.507059e+37 }
 0x389   : > { %v481_v26 = vmul.f32 %v2044_v57, %v480_v61  ;;  %v755_v63 = vmul.f32 1.442695, %v740_v21 }
 0x38b   : > { %v482_v6 = vadd.f32 %v2044_v57, %v481_v26 }
 0x38c   : > { %v2048_v4 = vpop.eup %2047  ;;  %v2542_v54 = vpop.f32.mrf.mxu3 }
 0x38d   : > { %v464_v8 = vmul.f32 %v2048_v4, %v441_v59  ;;  %v402_v10 = vpop.xlane.xlu0 %401  ;;  %v486_v20 = vsel %vm2523_vm8, %v2044_v57, %v482_v6  ;;  %vm469_vm9 = vweird.f32 %v2048_v4  ;;  %v908_v57 = vpop.permute.xlu2 %907 }
 0x38e   : > { %773 = vadd.xlane.f32.xlu0 %v772_v5  ;;  %v418_v12 = vsub.f32 %v2334_v37, %v402_v10  ;;  %vm470_vm12 = vmor %vm468_vm11, %vm469_vm9  ;;  %v491_v2 = vsel %vm488_vm10, %v490_v62, %v486_v20  ;;  %v2548_v55 = vpop.f32.mrf.mxu2 }
 0x38f   : > { %v465_v14 = vsub.f32 1.0, %v464_v8  ;;  %v492_v3 = vmul.f32 %v2419_v15, %v491_v2  ;;  %v1366_v15 = vsel %vm390_vm2, %v2542_v54, -inf }
 0x390   : > { %v429_v18 = vmul.f32 1.442695, %v418_v12 }
 0x391   : > { %v466_v23 = vmul.f32 %v2048_v4, %v465_v14 }
 0x392   : > { %2049 = vpow2.f32 %v429_v18 }
 0x393   : > { %v467_v37 = vadd.f32 %v2048_v4, %v466_v23  ;;  %2051 = vpow2.f32 %v753_v16 }
 0x395   : > { %v471_v22 = vsel %vm470_vm12, %v2048_v4, %v467_v37 }
 0x396   : > { %1361 = vmax.xlane.f32.xlu0 %v1360_v48  ;;  %v476_v32 = vsel %vm473_vm13, %v475_v25, %v471_v22  ;;  %v2562_v5 = vpop.f32.mrf.mxu2 }
 0x397   : > { %v477_v40 = vmul.f32 %v2427_v56, %v476_v32  ;;  %v762_v56 = vpop.xlane.xlu1 %761 }
 0x398   : > { %v2533_v45 = vpop.eup %2049  ;;  %2053 = vrcp.f32 %v762_v56  ;;  %v807_v44 = vand.u32 2147483648, %v762_v56  ;;  %vm801_vm5 = vweird.f32 %v762_v56  ;;  %v805_v13 = vand.u32 2147483647, %v762_v56 }
 0x399   : > { %v2535_v49 = vpop.eup %2051  ;;  %v448_v7 = vsel %vm390_vm2, %v2533_v45, 0.0  ;;  %v583_v52 = vpack.c.bf16 %v492_v3, %v477_v40 }
 0x39a   : > { %449 = vadd.xlane.f32.xlu2 %v448_v7  ;;  %v775_v36 = vsel %vm390_vm2, %v2535_v49, 0.0  ;;  %v808_v48 = vor.u32 1.1754944e-38, %v807_v44  ;;  %vm806_vm8 = vcmp.eq.f32.partialorder %v805_v13, 8.507059e+37 }
 0x39b   : > { %1869 = vmatmul.msk.bf16.vlgmr.msrb.gmra.mxu0 %vm390_vm2, %v583_v52 }
 0x39e   : > { %776 = vadd.xlane.f32.xlu0 %v775_v36  ;;  %v2054_v9 = vpop.eup %2053 }
 0x39f   : > { %1229 = vrot.lane.b32.xlu1 %v2239_v50, %s2156_s14  ;;  %v2550_v1 = vpop.xlane.xlu1 %1346  ;;  %v797_v59 = vmul.f32 %v2054_v9, %v762_v56  ;;  %vm802_vm15 = vweird.f32 %v2054_v9 }
 0x3a0   : > { %vm803_vm6 = vmor %vm801_vm5, %vm802_vm15 }
 0x3a1   : > { %v798_v4 = vsub.f32 1.0, %v797_v59 }
 0x3a2   : > { %1367 = vmax.xlane.f32.xlu2 %v1366_v15 }
 0x3a3   : > { %v799_v38 = vmul.f32 %v2054_v9, %v798_v4 }
 0x3a5   : > { %v800_v12 = vadd.f32 %v2054_v9, %v799_v38  ;;  %v1369_v38 = vsub.f32 %v2445_v39, %v2550_v1 }
 0x3a7   : > { %v2564_v6 = vpop.xlane.xlu1 %764  ;;  %v804_v62 = vsel %vm803_vm6, %v2054_v9, %v800_v12 }
 0x3a8   : > { %v809_v32 = vsel %vm806_vm8, %v808_v48, %v804_v62  ;;  %v822_v59 = vand.u32 2147483648, %v2564_v6  ;;  %vm816_vm13 = vweird.f32 %v2564_v6 }
 0x3a9   : > { %v810_v52 = vmul.f32 %v2435_v28, %v809_v32 }
 0x3b2   : > { %1227 = vrot.lane.b32.xlu0 %v2230_v41, %s2156_s14 }
 0x3b3   : > { %v759_v19 = vpop.xlane.xlu0 %758 }
 0x3b4   : > { %2055 = vrcp.f32 %v759_v19  ;;  %vm786_vm3 = vweird.f32 %v759_v19  ;;  %v790_v47 = vand.u32 2147483647, %v759_v19 }
 0x3b5   : > { %v906_v36 = vpop.permute.xlu1 %905 }
 0x3b6   : > { %vm791_vm7 = vcmp.eq.f32.partialorder %v790_v47, 8.507059e+37  ;;  %v1377_v47 = vmul.f32 1.442695, %v1369_v38 }
 0x3ba   : > { %v2056_v61 = vpop.eup %2055  ;;  %1545 = vrot.lane.b32.xlu0 %v2230_v41, %s2157_s15  ;;  %1547 = vrot.lane.b32.xlu2 %v2239_v50, %s2157_s15  ;;  %v792_v50 = vand.u32 2147483648, %v759_v19 }
 0x3bb   : > { %v782_v26 = vmul.f32 %v2056_v61, %v759_v19  ;;  %v2560_v0 = vpop.xlane.xlu2 %767  ;;  %vm787_vm14 = vweird.f32 %v2056_v61 }
 0x3bc   : > { %2057 = vrcp.f32 %v2560_v0  ;;  %vm788_vm4 = vmor %vm786_vm3, %vm787_vm14  ;;  %v793_v24 = vor.u32 1.1754944e-38, %v792_v50  ;;  %vm831_vm11 = vweird.f32 %v2560_v0  ;;  %v835_v28 = vand.u32 2147483647, %v2560_v0 }
 0x3bd   : > { %v783_v8 = vsub.f32 1.0, %v782_v26  ;;  %2059 = vpow2.f32 %v755_v63  ;;  %v820_v63 = vand.u32 2147483647, %v2564_v6 }
 0x3be   : > { %2061 = vrcp.f32 %v2564_v6  ;;  %vm836_vm15 = vcmp.eq.f32.partialorder %v835_v28, 8.507059e+37 }
 0x3bf   : > { %v784_v17 = vmul.f32 %v2056_v61, %v783_v8  ;;  %vm821_vm3 = vcmp.eq.f32.partialorder %v820_v63, 8.507059e+37  ;;  %2063 = vpow2.f32 %v1377_v47 }
 0x3c1   : > { %v785_v41 = vadd.f32 %v2056_v61, %v784_v17 }
 0x3c2   : > { %v2568_v10 = vpop.eup %2057  ;;  %1225 = vrot.lane.b32.xlu2 %v2220_v29, %s2156_s14 }
 0x3c3   : > { %v2572_v11 = vpop.eup %2059  ;;  %v789_v18 = vsel %vm788_vm4, %v2056_v61, %v785_v41  ;;  %v827_v20 = vmul.f32 %v2568_v10, %v2560_v0  ;;  %vm832_vm9 = vweird.f32 %v2568_v10 }
 0x3c4   : > { %v2574_v14 = vpop.f32.mrf.mxu2  ;;  %v2062_v16 = vpop.eup %2061  ;;  %v778_v25 = vsel %vm390_vm2, %v2572_v11, 0.0  ;;  %v794_v2 = vsel %vm791_vm7, %v793_v24, %v789_v18  ;;  %vm833_vm12 = vmor %vm831_vm11, %vm832_vm9 }
 0x3c5   : > { %v812_v37 = vmul.f32 %v2062_v16, %v2564_v6  ;;  %v828_v22 = vsub.f32 1.0, %v827_v20  ;;  %v795_v3 = vmul.f32 %v2461_v34, %v794_v2  ;;  %vm817_vm10 = vweird.f32 %v2062_v16  ;;  %v2613_v1 = vpop.eup %2063 }
 0x3c6   : > { %v910_v23 = vpop.permute.xlu0 %909  ;;  %vm818_vm14 = vmor %vm816_vm13, %vm817_vm10  ;;  %v1393_v13 = vsel %vm390_vm2, %v2613_v1, 0.0 }
 0x3c7   : > { %934 = vmatpush.bf16.msra.mxu0 %v910_v23  ;;  %v813_v40 = vsub.f32 1.0, %v812_v37  ;;  %v829_v15 = vmul.f32 %v2568_v10, %v828_v22  ;;  %v901_v19 = vpack.c.bf16 %v810_v52, %v795_v3 }
 0x3c9   : > { %779 = vadd.xlane.f32.xlu1 %v778_v25  ;;  %v814_v56 = vmul.f32 %v2062_v16, %v813_v40  ;;  %v830_v9 = vadd.f32 %v2568_v10, %v829_v15 }
 0x3cb   : > { %935 = vmatpush.bf16.msra.mxu0 %v908_v57  ;;  %v837_v57 = vand.u32 2147483648, %v2560_v0  ;;  %v815_v21 = vadd.f32 %v2062_v16, %v814_v56  ;;  %v834_v26 = vsel %vm833_vm12, %v2568_v10, %v830_v9  ;;  %v823_v0 = vor.u32 1.1754944e-38, %v822_v59 }
 0x3cc   : > { %v2582_v7 = vpop.f32.mrf.mxu2 }
 0x3cd   : > { %v838_v4 = vor.u32 1.1754944e-38, %v837_v57  ;;  %v819_v8 = vsel %vm818_vm14, %v2062_v16, %v815_v21 }
 0x3ce   : > { %v824_v41 = vsel %vm821_vm3, %v823_v0, %v819_v8 }
 0x3cf   : > { %936 = vmatpush.bf16.msra.mxu0 %v906_v36  ;;  %v839_v17 = vsel %vm836_vm15, %v838_v4, %v834_v26  ;;  %v825_v10 = vmul.f32 %v2449_v43, %v824_v41 }
 0x3d0   : > { %v840_v12 = vmul.f32 %v2470_v60, %v839_v17  ;;  %v2615_v60 = vpop.xlane.xlu2 %1352 }
 0x3d2   : > { %1877 = vmatmul.msk.bf16.vlgmr.msra.gmra.mxu0 %vm390_vm2, %v901_v19  ;;  %v902_v44 = vpack.c.bf16 %v840_v12, %v825_v10 }
 0x3d4   : > { %v2592_v34 = vpop.f32.mrf.mxu2 }
 0x3d5   : > { %v1027_v61 = vsel %vm390_vm2, %v2592_v34, -inf }
 0x3d6   : > { %1028 = vmax.xlane.f32.xlu1 %v1027_v61 }
 0x3d8   : > { %v771_v20 = vpop.xlane.xlu2 %770 }
 0x3d9   : > { %2065 = vrcp.f32 %v771_v20  ;;  %v852_v8 = vand.u32 2147483648, %v771_v20  ;;  %vm846_vm5 = vweird.f32 %v771_v20  ;;  %v850_v17 = vand.u32 2147483647, %v771_v20 }
 0x3db   : > { %vm851_vm9 = vcmp.eq.f32.partialorder %v850_v17, 8.507059e+37 }
 0x3dc   : > { %v2602_v50 = vpop.f32.mrf.mxu2 }
 0x3dd   : > { %v1030_v6 = vsel %vm390_vm2, %v2602_v50, -inf }
 0x3de   : > { %1031 = vmax.xlane.f32.xlu1 %v1030_v6 }
 0x3df   : > { %v2066_v2 = vpop.eup %2065 }
 0x3e0   : > { %v2631_v3 = vpop.xlane.xlu1 %446  ;;  %v2642_v57 = vpop.xlane.xlu2 %1358  ;;  %vm847_vm4 = vweird.f32 %v2066_v2 }
 0x3e1   : > { %vm2652_vm6 = vmor %vm846_vm5, %vm847_vm4  ;;  %vm498_vm13 = vweird.f32 %v2631_v3 }
 0x3e2   : > { %1878 = vmatmul.msk.bf16.gmra.mxu0 %vm390_vm2, %v902_v44 }
 0x3e4   : > { %v2609_v16 = vpop.f32.mrf.mxu2 }
 0x3e5   : > { %v1033_v39 = vsel %vm390_vm2, %v2609_v16, -inf }
 0x3e6   : > { %1034 = vmax.xlane.f32.xlu1 %v1033_v39 }
 0x3eb   : > { %1394 = vadd.xlane.f32.xlu2 %v1393_v13  ;;  %v853_v13 = vor.u32 1.1754944e-38, %v852_v8 }
 0x3ec   : > { %v2619_v18 = vpop.f32.mrf.mxu2 }
 0x3ed   : > { %v1036_v19 = vsel %vm390_vm2, %v2619_v18, -inf }
 0x3f1   : > { %v1350_v43 = vpop.xlane.xlu0 %1349 }
 0x3f2   : > { %v1370_v23 = vsub.f32 %v2465_v30, %v1350_v43  ;;  %v842_v30 = vmul.f32 %v2066_v2, %v771_v20 }
 0x3f4   : > { %v1379_v24 = vmul.f32 1.442695, %v1370_v23  ;;  %v2622_v62 = vpop.f32.mrf.mxu2  ;;  %v843_v15 = vsub.f32 1.0, %v842_v30 }
 0x3f5   : > { %v1039_v37 = vsel %vm390_vm2, %v2622_v62, -inf }
 0x3f6   : > { %2067 = vpow2.f32 %v1379_v24  ;;  %1040 = vmax.xlane.f32.xlu2 %v1039_v37  ;;  %v844_v9 = vmul.f32 %v2066_v2, %v843_v15 }
 0x3f8   : > { %v845_v26 = vadd.f32 %v2066_v2, %v844_v9 }
 0x3f9   : > { %v1356_v25 = vpop.xlane.xlu0 %1355  ;;  %v2648_v61 = vpop.xlane.xlu1 %1364 }
 0x3fa   : > { %v1372_v48 = vsub.f32 %v2483_v42, %v1356_v25  ;;  %v849_v39 = vsel %vm2652_vm6, %v2066_v2, %v845_v26 }
 0x3fb   : > { %v854_v24 = vsel %vm851_vm9, %v853_v13, %v849_v39 }
 0x3fc   : > { %v2627_v22 = vpop.eup %2067  ;;  %v1383_v32 = vmul.f32 1.442695, %v1372_v48  ;;  %v2633_v52 = vpop.f32.mrf.mxu2  ;;  %v855_v2 = vmul.f32 %v2481_v53, %v854_v24  ;;  %v502_v53 = vand.u32 2147483647, %v2631_v3 }
 0x3fd   : > { %v1396_v40 = vsel %vm390_vm2, %v2627_v22, 0.0  ;;  %v1042_v6 = vsel %vm390_vm2, %v2633_v52, -inf }
 0x3fe   : > { %2069 = vpow2.f32 %v1383_v32  ;;  %1397 = vadd.xlane.f32.xlu0 %v1396_v40  ;;  %vm503_vm3 = vcmp.eq.f32.partialorder %v502_v53, 8.507059e+37 }
 0x3ff   : > { %2071 = vrcp.f32 %v2631_v3 }
 0x401   : > { %v774_v36 = vpop.xlane.xlu0 %773 }
 0x402   : > { %2073 = vrcp.f32 %v774_v36  ;;  %v867_v12 = vand.u32 2147483648, %v774_v36  ;;  %v865_v10 = vand.u32 2147483647, %v774_v36  ;;  %vm861_vm8 = vweird.f32 %v774_v36 }
 0x404   : > { %v2636_v42 = vpop.eup %2069  ;;  %v2646_v59 = vpop.f32.mrf.mxu2  ;;  %v868_v20 = vor.u32 1.1754944e-38, %v867_v12  ;;  %vm866_vm11 = vcmp.eq.f32.partialorder %v865_v10, 8.507059e+37 }
 0x405   : > { %v1402_v56 = vsel %vm390_vm2, %v2636_v42, 0.0  ;;  %v2644_v21 = vpop.eup %2071 }
 0x406   : > { %1403 = vadd.xlane.f32.xlu1 %v1402_v56  ;;  %1037 = vmax.xlane.f32.xlu0 %v1036_v19  ;;  %v494_v4 = vmul.f32 %v2644_v21, %v2631_v3  ;;  %vm499_vm12 = vweird.f32 %v2644_v21 }
 0x407   : > { %vm500_vm14 = vmor %vm498_vm13, %vm499_vm12 }
 0x408   : > { %v2074_v28 = vpop.eup %2073  ;;  %v495_v47 = vsub.f32 1.0, %v494_v4 }
 0x409   : > { %v857_v63 = vmul.f32 %v2074_v28, %v774_v36  ;;  %vm862_vm7 = vweird.f32 %v2074_v28  ;;  %v1362_v48 = vpop.xlane.xlu0 %1361 }
 0x40a   : > { %vm863_vm10 = vmor %vm861_vm8, %vm862_vm7  ;;  %v496_v25 = vmul.f32 %v2644_v21, %v495_v47  ;;  %v1374_v24 = vsub.f32 %v2505_v27, %v1362_v48 }
 0x40b   : > { %v858_v0 = vsub.f32 1.0, %v857_v63 }
 0x40c   : > { %v2663_v32 = vpop.f32.mrf.mxu2  ;;  %v497_v15 = vadd.f32 %v2644_v21, %v496_v25 }
 0x40d   : > { %v859_v41 = vmul.f32 %v2074_v28, %v858_v0  ;;  %v450_v44 = vpop.xlane.xlu2 %449  ;;  %v1048_v36 = vsel %vm390_vm2, %v2663_v32, -inf }
 0x40e   : > { %1043 = vmax.xlane.f32.xlu0 %v1042_v6  ;;  %1543 = vrot.lane.b32.xlu2 %v2220_v29, %s2157_s15  ;;  %2075 = vrcp.f32 %v450_v44  ;;  %v519_v63 = vand.u32 2147483648, %v450_v44  ;;  %v501_v26 = vsel %vm500_vm14, %v2644_v21, %v497_v15  ;;  %v517_v8 = vand.u32 2147483647, %v450_v44 }
 0x40f   : > { %v860_v43 = vadd.f32 %v2074_v28, %v859_v41  ;;  %vm513_vm4 = vweird.f32 %v450_v44 }
 0x410   : > { %v520_v41 = vor.u32 1.1754944e-38, %v519_v63  ;;  %vm518_vm6 = vcmp.eq.f32.partialorder %v517_v8, 8.507059e+37 }
 0x411   : > { %v1230_v23 = vpop.permute.xlu1 %1229  ;;  %v864_v37 = vsel %vm863_vm10, %v2074_v28, %v860_v43  ;;  %v504_v28 = vand.u32 2147483648, %v2631_v3  ;;  %v777_v38 = vpop.xlane.xlu0 %776 }
 0x412   : > { %1251 = vmatpush.bf16.msra.mxu1 %v1230_v23  ;;  %v869_v29 = vsel %vm866_vm11, %v868_v20, %v864_v37  ;;  %v1371_v20 = vsub.f32 %v2475_v31, %v2615_v60  ;;  %2077 = vrcp.f32 %v777_v38  ;;  %vm876_vm8 = vweird.f32 %v777_v38 }
 0x413   : > { %v870_v40 = vmul.f32 %v2517_v35, %v869_v29  ;;  %v505_v0 = vor.u32 1.1754944e-38, %v504_v28 }
 0x414   : > { %v2076_v30 = vpop.eup %2075  ;;  %v1381_v23 = vmul.f32 1.442695, %v1371_v20 }
 0x415   : > { %v509_v56 = vmul.f32 %v2076_v30, %v450_v44  ;;  %v2671_v19 = vpop.xlane.xlu2 %1367  ;;  %v903_v9 = vpack.c.bf16 %v870_v40, %v855_v2  ;;  %vm514_vm15 = vweird.f32 %v2076_v30  ;;  %v506_v12 = vsel %vm503_vm3, %v505_v0, %v501_v26 }
 0x416   : > { %1049 = vmax.xlane.f32.xlu0 %v1048_v36  ;;  %vm515_vm5 = vmor %vm513_vm4, %vm514_vm15  ;;  %v507_v10 = vmul.f32 %v2497_v51, %v506_v12  ;;  %2079 = vpow2.f32 %v1381_v23  ;;  %v1045_v51 = vsel %vm390_vm2, %v2646_v59, -inf }
 0x417   : > { %v510_v35 = vsub.f32 1.0, %v509_v56  ;;  %1879 = vmatmul.msk.bf16.gmra.mxu0 %vm390_vm2, %v903_v9  ;;  %v882_v56 = vand.u32 2147483648, %v777_v38  ;;  %v880_v9 = vand.u32 2147483647, %v777_v38 }
 0x418   : > { %v2078_v37 = vpop.eup %2077 }
 0x419   : > { %v511_v4 = vmul.f32 %v2076_v30, %v510_v35  ;;  %v872_v25 = vmul.f32 %v2078_v37, %v777_v38  ;;  %vm877_vm7 = vweird.f32 %v2078_v37  ;;  %vm881_vm11 = vcmp.eq.f32.partialorder %v880_v9, 8.507059e+37 }
 0x41a   : > { %vm2696_vm9 = vmor %vm876_vm8, %vm877_vm7 }
 0x41b   : > { %v512_v17 = vadd.f32 %v2076_v30, %v511_v4  ;;  %v873_v2 = vsub.f32 1.0, %v872_v25 }
 0x41c   : > { %v2686_v29 = vpop.eup %2079 }
 0x41d   : > { %v516_v6 = vsel %vm515_vm5, %v2076_v30, %v512_v17  ;;  %v1548_v3 = vpop.permute.xlu2 %1547  ;;  %v2688_v30 = vpop.f32.mrf.mxu0  ;;  %v1399_v31 = vsel %vm390_vm2, %v2686_v29, 0.0  ;;  %v874_v27 = vmul.f32 %v2078_v37, %v873_v2  ;;  %v883_v17 = vor.u32 1.1754944e-38, %v882_v56 }
 0x41e   : > { %1569 = vmatpush.bf16.msrb.mxu0 %v1548_v3  ;;  %v521_v47 = vsel %vm518_vm6, %v520_v41, %v516_v6 }
 0x41f   : > { %v522_v21 = vmul.f32 %v2533_v45, %v521_v47  ;;  %v1387_v45 = vmul.f32 1.442695, %v1374_v24  ;;  %v875_v36 = vadd.f32 %v2078_v37, %v874_v27 }
 0x421   : > { %v584_v39 = vpack.c.bf16 %v522_v21, %v507_v10  ;;  %2081 = vpow2.f32 %v1387_v45  ;;  %v879_v0 = vsel %vm2696_vm9, %v2078_v37, %v875_v36 }
 0x422   : > { %v884_v3 = vsel %vm881_vm11, %v883_v17, %v879_v0 }
 0x423   : > { %1870 = vmatmul.msk.bf16.vlgmr.msrb.gmra.mxu1 %vm390_vm2, %v584_v39  ;;  %v885_v39 = vmul.f32 %v2535_v49, %v884_v3 }
 0x424   : > { %v1228_v13 = vpop.permute.xlu0 %1227 }
 0x425   : > { %1252 = vmatpush.bf16.msra.mxu1 %v1228_v13  ;;  %v1226_v43 = vpop.permute.xlu2 %1225  ;;  %v2700_v63 = vpop.f32.mrf.mxu0 }
 0x427   : > { %v2692_v60 = vpop.eup %2081 }
 0x428   : > { %v1408_v53 = vsel %vm390_vm2, %v2692_v60, 0.0 }
 0x429   : > { %1253 = vmatpush.bf16.msra.mxu1 %v1226_v43 }
 0x42c   : > { %v1546_v44 = vpop.permute.xlu0 %1545 }
 0x42d   : > { %1570 = vmatpush.bf16.msrb.mxu0 %v1546_v44 }
 0x437   : > { %1046 = vmax.xlane.f32.xlu2 %v1045_v51 }
 0x43c   : > { %v780_v40 = vpop.xlane.xlu1 %779 }
 0x43d   : > { %2083 = vrcp.f32 %v780_v40  ;;  %v897_v26 = vand.u32 2147483648, %v780_v40  ;;  %v895_v8 = vand.u32 2147483647, %v780_v40  ;;  %vm891_vm12 = vweird.f32 %v780_v40 }
 0x43f   : > { %1400 = vadd.xlane.f32.xlu2 %v1399_v31  ;;  %v898_v6 = vor.u32 1.1754944e-38, %v897_v26  ;;  %vm896_vm14 = vcmp.eq.f32.partialorder %v895_v8, 8.507059e+37 }
 0x443   : > { %v2084_v48 = vpop.eup %2083 }
 0x444   : > { %v887_v15 = vmul.f32 %v2084_v48, %v780_v40  ;;  %vm892_vm10 = vweird.f32 %v2084_v48 }
 0x445   : > { %vm893_vm13 = vmor %vm891_vm12, %vm892_vm10 }
 0x446   : > { %v888_v28 = vsub.f32 1.0, %v887_v15 }
 0x447   : > { %1409 = vadd.xlane.f32.xlu2 %v1408_v53 }
 0x448   : > { %v889_v4 = vmul.f32 %v2084_v48, %v888_v28 }
 0x449   : > { %v1029_v38 = vpop.xlane.xlu1 %1028 }
 0x44a   : > { %v890_v41 = vadd.f32 %v2084_v48, %v889_v4  ;;  %v1051_v12 = vsub.f32 %v2592_v34, %v1029_v38 }
 0x44c   : > { %v1059_v47 = vmul.f32 1.442695, %v1051_v12  ;;  %v894_v10 = vsel %vm893_vm13, %v2084_v48, %v890_v41 }
 0x44d   : > { %v899_v21 = vsel %vm896_vm14, %v898_v6, %v894_v10 }
 0x44e   : > { %2085 = vpow2.f32 %v1059_v47  ;;  %v900_v13 = vmul.f32 %v2572_v11, %v899_v21 }
 0x44f   : > { %v2707_v43 = vpop.f32.mrf.mxu0 }
 0x450   : > { %v904_v44 = vpack.c.bf16 %v900_v13, %v885_v39 }
 0x451   : > { %v1032_v20 = vpop.xlane.xlu1 %1031 }
 0x452   : > { %v1052_v23 = vsub.f32 %v2602_v50, %v1032_v20  ;;  %1880 = vmatmul.msk.bf16.gmra.mxu0 %vm390_vm2, %v904_v44 }
 0x454   : > { %v2711_v34 = vpop.eup %2085  ;;  %v1061_v24 = vmul.f32 1.442695, %v1052_v23 }
 0x455   : > { %v1075_v37 = vsel %vm390_vm2, %v2711_v34, 0.0 }
 0x456   : > { %2087 = vpow2.f32 %v1061_v24  ;;  %1076 = vadd.xlane.f32.xlu0 %v1075_v37 }
 0x457   : > { %v2715_v51 = vpop.f32.mrf.mxu0 }
 0x459   : > { %v1035_v49 = vpop.xlane.xlu1 %1034 }
 0x45a   : > { %v1053_v11 = vsub.f32 %v2609_v16, %v1035_v49 }
 0x45c   : > { %v2718_v45 = vpop.eup %2087  ;;  %v1063_v25 = vmul.f32 1.442695, %v1053_v11 }
 0x45d   : > { %v1078_v50 = vsel %vm390_vm2, %v2718_v45, 0.0 }
 0x45e   : > { %2089 = vpow2.f32 %v1063_v25  ;;  %1079 = vadd.xlane.f32.xlu1 %v1078_v50  ;;  %v1395_v40 = vpop.xlane.xlu2 %1394 }
 0x45f   : > { %v2722_v2 = vpop.f32.mrf.mxu0  ;;  %2091 = vrcp.f32 %v1395_v40  ;;  %v1428_v12 = vand.u32 2147483648, %v1395_v40  ;;  %vm1422_vm3 = vweird.f32 %v1395_v40  ;;  %v1426_v3 = vand.u32 2147483647, %v1395_v40 }
 0x461   : > { %v1429_v20 = vor.u32 1.1754944e-38, %v1428_v12  ;;  %vm1427_vm6 = vcmp.eq.f32.partialorder %v1426_v3, 8.507059e+37 }
 0x464   : > { %v2724_v31 = vpop.eup %2089 }
 0x465   : > { %v1081_v27 = vsel %vm390_vm2, %v2724_v31, 0.0  ;;  %v2092_v15 = vpop.eup %2091 }
 0x466   : > { %1082 = vadd.xlane.f32.xlu1 %v1081_v27  ;;  %v1418_v28 = vmul.f32 %v2092_v15, %v1395_v40  ;;  %vm1423_vm15 = vweird.f32 %v2092_v15 }
 0x467   : > { %v2728_v48 = vpop.f32.mrf.mxu0  ;;  %vm1424_vm4 = vmor %vm1422_vm3, %vm1423_vm15 }
 0x468   : > { %v1964_v16 = vpack.i.bf16 %v2728_v48, %v2722_v2  ;;  %v1419_v53 = vsub.f32 1.0, %v1418_v28 }
 0x469   : > { %v1041_v36 = vpop.xlane.xlu2 %1040 }
 0x46a   : > { %v1055_v56 = vsub.f32 %v2622_v62, %v1041_v36  ;;  %v1420_v8 = vmul.f32 %v2092_v15, %v1419_v53  ;;  %v1375_v36 = vsub.f32 %v2511_v58, %v2648_v61 }
 0x46c   : > { %v1067_v9 = vmul.f32 1.442695, %v1055_v56  ;;  %v1421_v38 = vadd.f32 %v2092_v15, %v1420_v8 }
 0x46e   : > { %2093 = vpow2.f32 %v1067_v9  ;;  %v1425_v39 = vsel %vm1424_vm4, %v2092_v15, %v1421_v38 }
 0x46f   : > { %v1430_v24 = vsel %vm1427_vm6, %v1429_v20, %v1425_v39 }
 0x470   : > { %v2742_v50 = vmul.f32 %v2613_v1, %v1430_v24 }
 0x471   : > { %v1398_v35 = vpop.xlane.xlu0 %1397  ;;  %v1544_v26 = vpop.permute.xlu2 %1543 }
 0x472   : > { %2095 = vrcp.f32 %v1398_v35  ;;  %1571 = vmatpush.bf16.msrb.mxu0 %v1544_v26  ;;  %v1443_v10 = vand.u32 2147483648, %v1398_v35  ;;  %v1441_v44 = vand.u32 2147483647, %v1398_v35  ;;  %vm1437_vm7 = vweird.f32 %v1398_v35 }
 0x474   : > { %v2733_v4 = vpop.eup %2093  ;;  %vm1442_vm9 = vcmp.eq.f32.partialorder %v1441_v44, 8.507059e+37 }
 0x475   : > { %v1087_v0 = vsel %vm390_vm2, %v2733_v4, 0.0 }
 0x476   : > { %1088 = vadd.xlane.f32.xlu2 %v1087_v0 }
 0x478   : > { %v2096_v17 = vpop.eup %2095 }
 0x479   : > { %v1433_v41 = vmul.f32 %v2096_v17, %v1398_v35  ;;  %v1038_v62 = vpop.xlane.xlu0 %1037  ;;  %vm1438_vm5 = vweird.f32 %v2096_v17  ;;  %v1376_v35 = vsub.f32 %v2542_v54, %v2671_v19 }
 0x47a   : > { %v1054_v6 = vsub.f32 %v2619_v18, %v1038_v62  ;;  %vm1439_vm8 = vmor %vm1437_vm7, %vm1438_vm5  ;;  %v1444_v18 = vor.u32 1.1754944e-38, %v1443_v10 }
 0x47b   : > { %v1434_v47 = vsub.f32 1.0, %v1433_v41  ;;  %v1391_v0 = vmul.f32 1.442695, %v1376_v35 }
 0x47c   : > { %v1065_v21 = vmul.f32 1.442695, %v1054_v6  ;;  %v1373_v6 = vsub.f32 %v2491_v46, %v2642_v57  ;;  %v1404_v46 = vpop.xlane.xlu1 %1403 }
 0x47d   : > { %v1435_v13 = vmul.f32 %v2096_v17, %v1434_v47  ;;  %vm1467_vm14 = vweird.f32 %v1404_v46 }
 0x47e   : > { %2097 = vpow2.f32 %v1065_v21  ;;  %v1385_v47 = vmul.f32 1.442695, %v1373_v6  ;;  %v1949_v21 = vpack.i.bf16 %v2715_v51, %v2707_v43 }
 0x47f   : > { %v1436_v23 = vadd.f32 %v2096_v17, %v1435_v13  ;;  %1541 = vrot.lane.b32.xlu1 %v2226_v33, %s2157_s15 }
 0x481   : > { %v1440_v37 = vsel %vm1439_vm8, %v2096_v17, %v1436_v23  ;;  %v1044_v49 = vpop.xlane.xlu0 %1043 }
 0x482   : > { %v1445_v11 = vsel %vm1442_vm9, %v1444_v18, %v1440_v37  ;;  %v1056_v25 = vsub.f32 %v2633_v52, %v1044_v49  ;;  %v1389_v52 = vmul.f32 1.442695, %v1375_v36 }
 0x483   : > { %v2745_v40 = vmul.f32 %v2627_v22, %v1445_v11 }
 0x484   : > { %v2747_v27 = vpop.eup %2097  ;;  %v1069_v15 = vmul.f32 1.442695, %v1056_v25 }
 0x485   : > { %v1084_v56 = vsel %vm390_vm2, %v2747_v27, 0.0  ;;  %v1537_v9 = vpack.c.bf16 %v2745_v40, %v2742_v50 }
 0x486   : > { %2099 = vpow2.f32 %v1069_v15  ;;  %1085 = vadd.xlane.f32.xlu0 %v1084_v56 }
 0x487   : > { %2101 = vpow2.f32 %v1389_v52 }
 0x489   : > { %v1050_v1 = vpop.xlane.xlu0 %1049 }
 0x48a   : > { %v1058_v22 = vsub.f32 %v2663_v32, %v1050_v1 }
 0x48c   : > { %v2755_v28 = vpop.eup %2099  ;;  %v1073_v58 = vmul.f32 1.442695, %v1058_v22 }
 0x48d   : > { %v1090_v53 = vsel %vm390_vm2, %v2755_v28, 0.0  ;;  %v2760_v61 = vpop.eup %2101 }
 0x48e   : > { %1091 = vadd.xlane.f32.xlu2 %v1090_v53  ;;  %2103 = vpow2.f32 %v1073_v58  ;;  %v1411_v8 = vsel %vm390_vm2, %v2760_v61, 0.0 }
 0x48f   : > { %2105 = vpow2.f32 %v1391_v0 }
 0x494   : > { %v2764_v26 = vpop.f32.mrf.mxu0  ;;  %v2768_v17 = vpop.eup %2103 }
 0x495   : > { %v1096_v38 = vsel %vm390_vm2, %v2768_v17, 0.0  ;;  %v2778_v19 = vpop.eup %2105 }
 0x496   : > { %1412 = vadd.xlane.f32.xlu2 %v1411_v8  ;;  %v1414_v41 = vsel %vm390_vm2, %v2778_v19, 0.0  ;;  %v1473_v8 = vand.u32 2147483648, %v1404_v46 }
 0x49a   : > { %1223 = vrot.lane.b32.xlu0 %v2226_v33, %s2156_s14 }
 0x49c   : > { %v2772_v32 = vpop.f32.mrf.mxu0 }
 0x49d   : > { %v1979_v54 = vpack.i.bf16 %v2772_v32, %v2764_v26 }
 0x49e   : > { %1097 = vadd.xlane.f32.xlu2 %v1096_v38  ;;  %v1471_v38 = vand.u32 2147483647, %v1404_v46 }
 0x4a0   : > { %vm1472_vm4 = vcmp.eq.f32.partialorder %v1471_v38, 8.507059e+37 }
 0x4a6   : > { %1415 = vadd.xlane.f32.xlu2 %v1414_v41 }
 0x4aa   : > { %v1047_v62 = vpop.xlane.xlu2 %1046 }
 0x4ab   : > { %v1057_v12 = vsub.f32 %v2646_v59, %v1047_v62 }
 0x4ad   : > { %v1071_v33 = vmul.f32 1.442695, %v1057_v12  ;;  %v1474_v12 = vor.u32 1.1754944e-38, %v1473_v8 }
 0x4af   : > { %2107 = vpow2.f32 %v1071_v33 }
 0x4b0   : > { %2109 = vpow2.f32 %v1385_v47 }
 0x4b2   : > { %v1401_v57 = vpop.xlane.xlu2 %1400 }
 0x4b3   : > { %2111 = vrcp.f32 %v1401_v57  ;;  %v1458_v1 = vand.u32 2147483648, %v1401_v57  ;;  %vm1452_vm12 = vweird.f32 %v1401_v57  ;;  %v1456_v35 = vand.u32 2147483647, %v1401_v57 }
 0x4b4   : > { %2113 = vrcp.f32 %v1404_v46 }
 0x4b5   : > { %v2785_v3 = vpop.eup %2107  ;;  %v1459_v40 = vor.u32 1.1754944e-38, %v1458_v1  ;;  %vm1457_vm3 = vcmp.eq.f32.partialorder %v1456_v35, 8.507059e+37 }
 0x4b6   : > { %v1093_v10 = vsel %vm390_vm2, %v2785_v3, 0.0  ;;  %v2792_v59 = vpop.eup %2109 }
 0x4b7   : > { %1094 = vadd.xlane.f32.xlu1 %v1093_v10  ;;  %v1405_v39 = vsel %vm390_vm2, %v2792_v59, 0.0 }
 0x4b9   : > { %v2112_v44 = vpop.eup %2111 }
 0x4ba   : > { %v2114_v20 = vpop.eup %2113  ;;  %v1448_v23 = vmul.f32 %v2112_v44, %v1401_v57  ;;  %vm1453_vm10 = vweird.f32 %v2112_v44  ;;  %v2814_v22 = vpop.xlane.xlu2 %1409 }
 0x4bb   : > { %v1463_v51 = vmul.f32 %v2114_v20, %v1404_v46  ;;  %vm1468_vm11 = vweird.f32 %v2114_v20  ;;  %vm1454_vm13 = vmor %vm1452_vm12, %vm1453_vm10 }
 0x4bc   : > { %v1449_v18 = vsub.f32 1.0, %v1448_v23  ;;  %vm1469_vm15 = vmor %vm1467_vm14, %vm1468_vm11 }
 0x4bd   : > { %v1464_v37 = vsub.f32 1.0, %v1463_v51 }
 0x4be   : > { %1950 = vrot.lane.b32.xlu2 %v1949_v21, %s2158_s16  ;;  %v1450_v11 = vmul.f32 %v2112_v44, %v1449_v18 }
 0x4bf   : > { %v1465_v15 = vmul.f32 %v2114_v20, %v1464_v37 }
 0x4c0   : > { %v1451_v52 = vadd.f32 %v2112_v44, %v1450_v11 }
 0x4c1   : > { %v1466_v58 = vadd.f32 %v2114_v20, %v1465_v15 }
 0x4c2   : > { %v1455_v50 = vsel %vm1454_vm13, %v2112_v44, %v1451_v52 }
 0x4c3   : > { %v1470_v62 = vsel %vm1469_vm15, %v2114_v20, %v1466_v58  ;;  %v1460_v6 = vsel %vm1457_vm3, %v1459_v40, %v1455_v50 }
 0x4c4   : > { %1406 = vadd.xlane.f32.xlu0 %v1405_v39  ;;  %v1475_v21 = vsel %vm1472_vm4, %v1474_v12, %v1470_v62  ;;  %v1461_v39 = vmul.f32 %v2686_v29, %v1460_v6 }
 0x4c5   : > { %v1476_v20 = vmul.f32 %v2636_v42, %v1475_v21 }
 0x4c7   : > { %v1538_v37 = vpack.c.bf16 %v1476_v20, %v1461_v39 }
 0x4c9   : > { %v2800_v43 = vpop.xlane.xlu0 %1076 }
 0x4ca   : > { %v1110_v29 = vand.u32 2147483648, %v2800_v43  ;;  %vm1104_vm9 = vweird.f32 %v2800_v43  ;;  %v1108_v11 = vand.u32 2147483647, %v2800_v43 }
 0x4cc   : > { %v1111_v1 = vor.u32 1.1754944e-38, %v1110_v29  ;;  %vm1109_vm12 = vcmp.eq.f32.partialorder %v1108_v11, 8.507059e+37 }
 0x4d1   : > { %v2796_v13 = vpop.xlane.xlu1 %1079 }
 0x4d2   : > { %2115 = vrcp.f32 %v2796_v13  ;;  %v1125_v44 = vand.u32 2147483648, %v2796_v13  ;;  %vm1119_vm7 = vweird.f32 %v2796_v13  ;;  %v1123_v51 = vand.u32 2147483647, %v2796_v13 }
 0x4d3   : > { %2117 = vrcp.f32 %v2800_v43 }
 0x4d4   : > { %v1126_v15 = vor.u32 1.1754944e-38, %v1125_v44  ;;  %vm1124_vm11 = vcmp.eq.f32.partialorder %v1123_v51, 8.507059e+37 }
 0x4d8   : > { %v2804_v49 = vpop.eup %2115 }
 0x4d9   : > { %v2798_v24 = vpop.xlane.xlu1 %1082  ;;  %v2806_v36 = vpop.eup %2117  ;;  %v1115_v56 = vmul.f32 %v2804_v49, %v2796_v13  ;;  %vm1120_vm5 = vweird.f32 %v2804_v49 }
 0x4da   : > { %v1100_v53 = vmul.f32 %v2806_v36, %v2800_v43  ;;  %vm1105_vm6 = vweird.f32 %v2806_v36  ;;  %vm1121_vm8 = vmor %vm1119_vm7, %vm1120_vm5  ;;  %v1140_v6 = vand.u32 2147483648, %v2798_v24  ;;  %vm1134_vm4 = vweird.f32 %v2798_v24 }
 0x4db   : > { %v1116_v0 = vsub.f32 1.0, %v1115_v56  ;;  %vm1106_vm10 = vmor %vm1104_vm9, %vm1105_vm6 }
 0x4dd   : > { %v1117_v33 = vmul.f32 %v2804_v49, %v1116_v0 }
 0x4df   : > { %v1118_v46 = vadd.f32 %v2804_v49, %v1117_v33 }
 0x4e9   : > { %v2824_v10 = vpop.xlane.xlu2 %1088 }
 0x4f1   : > { %v1542_v25 = vpop.permute.xlu1 %1541 }
 0x4f2   : > { %1572 = vmatpush.bf16.msrb.mxu0 %v1542_v25  ;;  %v1122_v25 = vsel %vm1121_vm8, %v2804_v49, %v1118_v46 }
 0x4f5   : > { %1893 = vmatmul.msk.bf16.vlgmr.msrb.gmra.mxu0 %vm390_vm2, %v1537_v9  ;;  %v1101_v9 = vsub.f32 1.0, %v1100_v53  ;;  %v1127_v53 = vsel %vm1124_vm11, %v1126_v15, %v1122_v25 }
 0x4f6   : > { %v1128_v49 = vmul.f32 %v2718_v45, %v1127_v53 }
 0x4f7   : > { %v1102_v47 = vmul.f32 %v2806_v36, %v1101_v9 }
 0x4f9   : > { %v2818_v41 = vpop.xlane.xlu0 %1085  ;;  %v1103_v23 = vadd.f32 %v2806_v36, %v1102_v47  ;;  %v1138_v47 = vand.u32 2147483647, %v2798_v24 }
 0x4fa   : > { %2119 = vrcp.f32 %v2818_v41  ;;  %v1155_v45 = vand.u32 2147483648, %v2818_v41  ;;  %vm1149_vm15 = vweird.f32 %v2818_v41 }
 0x4fb   : > { %2121 = vrcp.f32 %v2798_v24  ;;  %v1107_v56 = vsel %vm1106_vm10, %v2806_v36, %v1103_v23  ;;  %v1141_v23 = vor.u32 1.1754944e-38, %v1140_v6  ;;  %vm1139_vm7 = vcmp.eq.f32.partialorder %v1138_v47, 8.507059e+37 }
 0x4fc   : > { %v1112_v43 = vsel %vm1109_vm12, %v1111_v1, %v1107_v56  ;;  %v1156_v46 = vor.u32 1.1754944e-38, %v1155_v45  ;;  %vm1164_vm12 = vweird.f32 %v2824_v10 }
 0x4fd   : > { %v1113_v8 = vmul.f32 %v2711_v34, %v1112_v43  ;;  %v1153_v34 = vand.u32 2147483647, %v2818_v41 }
 0x4ff   : > { %v1219_v50 = vpack.c.bf16 %v1128_v49, %v1113_v8  ;;  %vm1154_vm6 = vcmp.eq.f32.partialorder %v1153_v34, 8.507059e+37 }
 0x500   : > { %v2120_v57 = vpop.eup %2119 }
 0x501   : > { %v2122_v18 = vpop.eup %2121  ;;  %v1145_v42 = vmul.f32 %v2120_v57, %v2818_v41  ;;  %v2843_v52 = vpop.xlane.xlu2 %1091  ;;  %vm1150_vm13 = vweird.f32 %v2120_v57 }
 0x502   : > { %v1130_v13 = vmul.f32 %v2122_v18, %v2798_v24  ;;  %2123 = vrcp.f32 %v2843_v52  ;;  %vm1135_vm14 = vweird.f32 %v2122_v18  ;;  %vm1151_vm3 = vmor %vm1149_vm15, %vm1150_vm13  ;;  %vm1179_vm10 = vweird.f32 %v2843_v52 }
 0x503   : > { %v1146_v58 = vsub.f32 1.0, %v1145_v42  ;;  %2125 = vrcp.f32 %v2824_v10  ;;  %vm1136_vm5 = vmor %vm1134_vm4, %vm1135_vm14  ;;  %v1183_v1 = vand.u32 2147483647, %v2843_v52 }
 0x504   : > { %v1131_v35 = vsub.f32 1.0, %v1130_v13 }
 0x505   : > { %1894 = vmatmul.msk.bf16.gmra.mxu0 %vm390_vm2, %v1538_v37  ;;  %v1147_v0 = vmul.f32 %v2120_v57, %v1146_v58  ;;  %vm1184_vm14 = vcmp.eq.f32.partialorder %v1183_v1, 8.507059e+37 }
 0x506   : > { %v1132_v36 = vmul.f32 %v2122_v18, %v1131_v35 }
 0x507   : > { %v1148_v40 = vadd.f32 %v2120_v57, %v1147_v0 }
 0x508   : > { %v2124_v62 = vpop.eup %2123  ;;  %v1133_v12 = vadd.f32 %v2122_v18, %v1132_v36 }
 0x509   : > { %v2849_v9 = vpop.xlane.xlu2 %1412  ;;  %v2126_v33 = vpop.eup %2125  ;;  %v1175_v21 = vmul.f32 %v2124_v62, %v2843_v52  ;;  %v1152_v39 = vsel %vm1151_vm3, %v2120_v57, %v1148_v40  ;;  %vm1180_vm8 = vweird.f32 %v2124_v62 }
 0x50a   : > { %v1160_v44 = vmul.f32 %v2126_v33, %v2824_v10  ;;  %v1137_v20 = vsel %vm1136_vm5, %v2122_v18, %v1133_v12  ;;  %v1157_v51 = vsel %vm1154_vm6, %v1156_v46, %v1152_v39  ;;  %v1185_v18 = vand.u32 2147483648, %v2843_v52  ;;  %vm1181_vm11 = vmor %vm1179_vm10, %vm1180_vm8 }
 0x50b   : > { %v1176_v41 = vsub.f32 1.0, %v1175_v21  ;;  %v1142_v29 = vsel %vm1139_vm7, %v1141_v23, %v1137_v20  ;;  %v1158_v25 = vmul.f32 %v2747_v27, %v1157_v51  ;;  %vm1165_vm9 = vweird.f32 %v2126_v33 }
 0x50c   : > { %v1224_v38 = vpop.permute.xlu0 %1223  ;;  %v1161_v37 = vsub.f32 1.0, %v1160_v44  ;;  %v1143_v24 = vmul.f32 %v2724_v31, %v1142_v29  ;;  %v1170_v27 = vand.u32 2147483648, %v2824_v10  ;;  %v1168_v31 = vand.u32 2147483647, %v2824_v10  ;;  %vm1166_vm13 = vmor %vm1164_vm12, %vm1165_vm9 }
 0x50d   : > { %1254 = vmatpush.bf16.msra.mxu1 %v1224_v38  ;;  %v1177_v42 = vmul.f32 %v2124_v62, %v1176_v41  ;;  %v1186_v43 = vor.u32 1.1754944e-38, %v1185_v18  ;;  %vm1497_vm12 = vweird.f32 %v2814_v22 }
 0x50e   : > { %v1162_v57 = vmul.f32 %v2126_v33, %v1161_v37  ;;  %v1220_v15 = vpack.c.bf16 %v1158_v25, %v1143_v24  ;;  %v1171_v8 = vor.u32 1.1754944e-38, %v1170_v27  ;;  %vm1169_vm15 = vcmp.eq.f32.partialorder %v1168_v31, 8.507059e+37 }
 0x50f   : > { %v1178_v56 = vadd.f32 %v2124_v62, %v1177_v42 }
 0x510   : > { %1885 = vmatmul.msk.bf16.vlgmr.msra.gmra.mxu1 %vm390_vm2, %v1219_v50  ;;  %v1163_v13 = vadd.f32 %v2126_v33, %v1162_v57 }
 0x511   : > { %v1098_v11 = vpop.xlane.xlu2 %1097  ;;  %v1182_v58 = vsel %vm1181_vm11, %v2124_v62, %v1178_v56 }
 0x512   : > { %2127 = vrcp.f32 %v1098_v11  ;;  %v1167_v35 = vsel %vm1166_vm13, %v2126_v33, %v1163_v13  ;;  %v1187_v0 = vsel %vm1184_vm14, %v1186_v43, %v1182_v58  ;;  %v1215_v47 = vand.u32 2147483648, %v1098_v11 }
 0x513   : > { %2129 = vrcp.f32 %v2814_v22  ;;  %v1172_v52 = vsel %vm1169_vm15, %v1171_v8, %v1167_v35  ;;  %v1188_v50 = vmul.f32 %v2755_v28, %v1187_v0  ;;  %vm1209_vm4 = vweird.f32 %v1098_v11 }
 0x514   : > { %v1173_v40 = vmul.f32 %v2733_v4, %v1172_v52  ;;  %v1213_v21 = vand.u32 2147483647, %v1098_v11  ;;  %v1216_v41 = vor.u32 1.1754944e-38, %v1215_v47  ;;  %v1503_v58 = vand.u32 2147483648, %v2814_v22 }
 0x516   : > { %v1221_v45 = vpack.c.bf16 %v1188_v50, %v1173_v40  ;;  %vm1214_vm7 = vcmp.eq.f32.partialorder %v1213_v21, 8.507059e+37 }
 0x518   : > { %v2128_v53 = vpop.eup %2127 }
 0x519   : > { %v1205_v49 = vmul.f32 %v2128_v53, %v1098_v11  ;;  %v2872_v10 = vpop.eup %2129  ;;  %vm1210_vm3 = vweird.f32 %v2128_v53  ;;  %v2877_v28 = vpop.xlane.xlu2 %1415 }
 0x51a   : > { %v1493_v34 = vmul.f32 %v2872_v10, %v2814_v22  ;;  %vm2879_vm5 = vmor %vm1209_vm4, %vm1210_vm3  ;;  %vm1498_vm11 = vweird.f32 %v2872_v10 }
 0x51b   : > { %v1206_v38 = vsub.f32 1.0, %v1205_v49  ;;  %vm2895_vm13 = vmor %vm1497_vm12, %vm1498_vm11 }
 0x51c   : > { %v1494_v4 = vsub.f32 1.0, %v1493_v34 }
 0x51d   : > { %v1207_v62 = vmul.f32 %v2128_v53, %v1206_v38 }
 0x51e   : > { %v1495_v42 = vmul.f32 %v2872_v10, %v1494_v4  ;;  %v1533_v4 = vand.u32 2147483648, %v2877_v28 }
 0x51f   : > { %v1208_v33 = vadd.f32 %v2128_v53, %v1207_v62 }
 0x520   : > { %1886 = vmatmul.msk.bf16.gmra.mxu1 %vm390_vm2, %v1220_v15  ;;  %v1496_v1 = vadd.f32 %v2872_v10, %v1495_v42  ;;  %v953_v42 = vpop.f32.mrf.mxu0 }
 0x521   : > { %v1212_v51 = vsel %vm2879_vm5, %v2128_v53, %v1208_v33 }
 0x522   : > { %v1217_v25 = vsel %vm1214_vm7, %v1216_v41, %v1212_v51  ;;  %v1500_v8 = vsel %vm2895_vm13, %v2872_v10, %v1496_v1 }
 0x523   : > { %v1218_v56 = vmul.f32 %v2768_v17, %v1217_v25  ;;  %v1501_v17 = vand.u32 2147483647, %v2814_v22 }
 0x525   : > { %vm1502_vm15 = vcmp.eq.f32.partialorder %v1501_v17, 8.507059e+37 }
 0x52a   : > { %v1095_v36 = vpop.xlane.xlu1 %1094 }
 0x52b   : > { %2131 = vrcp.f32 %v1095_v36  ;;  %v1200_v44 = vand.u32 2147483648, %v1095_v36  ;;  %v1198_v23 = vand.u32 2147483647, %v1095_v36  ;;  %vm1194_vm8 = vweird.f32 %v1095_v36 }
 0x52c   : > { %2133 = vrcp.f32 %v2877_v28 }
 0x52d   : > { %v1201_v11 = vor.u32 1.1754944e-38, %v1200_v44  ;;  %vm1199_vm10 = vcmp.eq.f32.partialorder %v1198_v23, 8.507059e+37  ;;  %v1531_v44 = vand.u32 2147483647, %v2877_v28  ;;  %v1534_v23 = vor.u32 1.1754944e-38, %v1533_v4 }
 0x52f   : > { %vm1532_vm12 = vcmp.eq.f32.partialorder %v1531_v44, 8.507059e+37 }
 0x530   : > { %1887 = vmatmul.msk.bf16.gmra.mxu1 %vm390_vm2, %v1221_v45 }
 0x531   : > { %v2132_v12 = vpop.eup %2131 }
 0x532   : > { %v1190_v6 = vmul.f32 %v2132_v12, %v1095_v36  ;;  %vm1195_vm6 = vweird.f32 %v2132_v12  ;;  %v2134_v18 = vpop.eup %2133  ;;  %v1504_v36 = vor.u32 1.1754944e-38, %v1503_v58 }
 0x533   : > { %vm1196_vm9 = vmor %vm1194_vm8, %vm1195_vm6  ;;  %vm1528_vm6 = vweird.f32 %v2134_v18  ;;  %vm1527_vm8 = vweird.f32 %v2877_v28 }
 0x534   : > { %v1191_v39 = vsub.f32 1.0, %v1190_v6  ;;  %v1505_v62 = vsel %vm1502_vm15, %v1504_v36, %v1500_v8  ;;  %v1915_v36 = vld [vmem:[%s2995_s3] sm:$0xff] }
 0x535   : > { %v1506_v6 = vmul.f32 %v2692_v60, %v1505_v62  ;;  %v1516_v60 = vand.u32 2147483647, %v2849_v9 }
 0x536   : > { %v1192_v20 = vmul.f32 %v2132_v12, %v1191_v39 }
 0x537   : > { %v1407_v29 = vpop.xlane.xlu0 %1406  ;;  %vm1517_vm13 = vcmp.eq.f32.partialorder %v1516_v60, 8.507059e+37 }
 0x538   : > { %v1193_v37 = vadd.f32 %v2132_v12, %v1192_v20  ;;  %2135 = vrcp.f32 %v1407_v29  ;;  %v1488_v35 = vand.u32 2147483648, %v1407_v29  ;;  %v1486_v38 = vand.u32 2147483647, %v1407_v29 }
 0x539   : > { %2137 = vrcp.f32 %v2849_v9  ;;  %vm1482_vm3 = vweird.f32 %v1407_v29  ;;  %v1518_v20 = vand.u32 2147483648, %v2849_v9 }
 0x53a   : > { %v1197_v24 = vsel %vm1196_vm9, %v2132_v12, %v1193_v37  ;;  %v1489_v22 = vor.u32 1.1754944e-38, %v1488_v35  ;;  %vm1487_vm5 = vcmp.eq.f32.partialorder %v1486_v38, 8.507059e+37  ;;  %vm1529_vm9 = vmor %vm1527_vm8, %vm1528_vm6 }
 0x53b   : > { %v1202_v57 = vsel %vm1199_vm10, %v1201_v11, %v1197_v24  ;;  %vm1512_vm10 = vweird.f32 %v2849_v9  ;;  %v1519_v41 = vor.u32 1.1754944e-38, %v1518_v20  ;;  %v955_v24 = vpop.f32.mrf.mxu0 }
 0x53c   : > { %v1203_v15 = vmul.f32 %v2785_v3, %v1202_v57  ;;  %v1523_v3 = vmul.f32 %v2134_v18, %v2877_v28 }
 0x53e   : > { %v2136_v13 = vpop.eup %2135  ;;  %v1222_v53 = vpack.c.bf16 %v1218_v56, %v1203_v15  ;;  %v1524_v50 = vsub.f32 1.0, %v1523_v3  ;;  %v2917_v15 = vpop.f32.mrf.mxu1 }
 0x53f   : > { %v1478_v27 = vmul.f32 %v2136_v13, %v1407_v29  ;;  %v2138_v31 = vpop.eup %2137  ;;  %vm1483_vm14 = vweird.f32 %v2136_v13 }
 0x540   : > { %1888 = vmatmul.msk.bf16.gmra.mxu1 %vm390_vm2, %v1222_v53  ;;  %v1508_v0 = vmul.f32 %v2138_v31, %v2849_v9  ;;  %vm1484_vm4 = vmor %vm1482_vm3, %vm1483_vm14  ;;  %v1525_v33 = vmul.f32 %v2134_v18, %v1524_v50  ;;  %vm1513_vm7 = vweird.f32 %v2138_v31  ;;  %v1951_v50 = vpop.permute.xlu2 %1950  ;;  %vm1707_vm14 = vcmask 195584  }
 0x541   : > { %v1479_v49 = vsub.f32 1.0, %v1478_v27  ;;  %vm1514_vm11 = vmor %vm1512_vm10, %vm1513_vm7 }
 0x542   : > { %v1509_v45 = vsub.f32 1.0, %v1508_v0  ;;  %v1526_v39 = vadd.f32 %v2134_v18, %v1525_v33 }
 0x543   : > { %v1480_v52 = vmul.f32 %v2136_v13, %v1479_v49  ;;  %v1994_v49 = vpack.i.bf16 %v955_v24, %v953_v42 }
 0x544   : > { %v1510_v47 = vmul.f32 %v2138_v31, %v1509_v45 }
 0x545   : > { %v1481_v40 = vadd.f32 %v2136_v13, %v1480_v52 }
 0x546   : > { %v1511_v46 = vadd.f32 %v2138_v31, %v1510_v47 }
 0x547   : > { %v1485_v12 = vsel %vm1484_vm4, %v2136_v13, %v1481_v40  ;;  %v1953_v40 = vunpack.i.h.bf16 %v1951_v50 }
 0x548   : > { %v1490_v34 = vsel %vm1487_vm5, %v1489_v22, %v1485_v12  ;;  %v1515_v51 = vsel %vm1514_vm11, %v2138_v31, %v1511_v46  ;;  %v1952_v22 = vunpack.i.l.bf16 %v1951_v50 }
 0x549   : > { %v1491_v10 = vmul.f32 %v2792_v59, %v1490_v34  ;;  %v1530_v59 = vsel %vm1529_vm9, %v2134_v18, %v1526_v39  ;;  %v1520_v37 = vsel %vm1517_vm13, %v1519_v41, %v1515_v51  ;;  %v627_v18 = vpop.f32.mrf.mxu1  ;;  %v1691_v33 = vsel %vm336_vm1, %v2700_v63, %v1953_v40 }
 0x54a   : > { %v1535_v29 = vsel %vm1532_vm12, %v1534_v23, %v1530_v59  ;;  %v1521_v28 = vmul.f32 %v2760_v61, %v1520_v37 }
 0x54b   : > { %v1539_v21 = vpack.c.bf16 %v1506_v6, %v1491_v10  ;;  %v1536_v11 = vmul.f32 %v2778_v19, %v1535_v29  ;;  %v1690_v10 = vsel %vm336_vm1, %v2688_v30, %v1952_v22 }
 0x54d   : > { %1895 = vmatmul.msk.bf16.gmra.mxu0 %vm390_vm2, %v1539_v21  ;;  %v1540_v25 = vpack.c.bf16 %v1536_v11, %v1521_v28 }
 0x55d   : > { %1896 = vmatmul.msk.bf16.gmra.mxu0 %vm390_vm2, %v1540_v25  ;;  %vm1698_vm2 = vcmask 130048  }
 0x572   : > { %v1574_v57 = vpop.f32.mrf.mxu0 }
 0x57a   : > { %v1576_v9 = vpop.f32.mrf.mxu0 }
 0x57b   : > { %v1959_v56 = vpack.i.bf16 %v1576_v9, %v1574_v57 }
 0x57d   : > { %1960 = vrot.lane.b32.xlu1 %v1959_v56, %s2159_s17 }
 0x582   : > { %v1579_v61 = vpop.f32.mrf.mxu0 }
 0x58a   : > { %v1581_v27 = vpop.f32.mrf.mxu0 }
 0x58b   : > { %v1974_v58 = vpack.i.bf16 %v1581_v27, %v1579_v61 }
 0x58d   : > { %v1256_v13 = vpop.f32.mrf.mxu1 }
 0x595   : > { %v1258_v1 = vpop.f32.mrf.mxu1 }
 0x596   : > { %v1954_v53 = vpack.i.bf16 %v1258_v1, %v1256_v13 }
 0x598   : > { %1955 = vrot.lane.b32.xlu0 %v1954_v53, %s2160_s20 }
 0x59d   : > { %v1261_v19 = vpop.f32.mrf.mxu1 }
 0x5a0   : > { %1965 = vrot.lane.b32.xlu0 %v1964_v16, %s2158_s16  ;;  %v1916_v16 = vld [vmem:[%s2995_s3 + $0x8] sm:$0xff] }
 0x5a1   : > { %1758 = vmatpush.bf16.msra.mxu2 %v1916_v16 }
 0x5a5   : > { %v1263_v31 = vpop.f32.mrf.mxu1  ;;  %1759 = vmatpush.bf16.msra.mxu2 %v1915_v36 }
 0x5a6   : > { %v1969_v43 = vpack.i.bf16 %v1263_v31, %v1261_v19 }
 0x5a8   : > { %1970 = vrot.lane.b32.xlu2 %v1969_v43, %s2160_s20  ;;  %1975 = vrot.lane.b32.xlu0 %v1974_v58, %s2159_s17 }
 0x5ad   : > { %v1266_v17 = vpop.f32.mrf.mxu1 }
 0x5b0   : > { %1980 = vrot.lane.b32.xlu2 %v1979_v54, %s2158_s16 }
 0x5b5   : > { %v1268_v3 = vpop.f32.mrf.mxu1 }
 0x5b6   : > { %v1984_v35 = vpack.i.bf16 %v1268_v3, %v1266_v17 }
 0x5b8   : > { %1995 = vrot.lane.b32.xlu2 %v1994_v49, %s2158_s16  ;;  %1985 = vrot.lane.b32.xlu1 %v1984_v35, %s2160_s20 }
 0x5bd   : > { %v1271_v2 = vpop.f32.mrf.mxu1 }
 0x5c5   : > { %v1273_v48 = vpop.f32.mrf.mxu1 }
 0x5c6   : > { %v1999_v8 = vpack.i.bf16 %v1273_v48, %v1271_v2 }
 0x5c8   : > { %2000 = vrot.lane.b32.xlu1 %v1999_v8, %s2160_s20 }
 0x5ca   : > { %v1584_v0 = vpop.f32.mrf.mxu0 }
 0x5d2   : > { %v1586_v52 = vpop.f32.mrf.mxu0 }
 0x5d3   : > { %v1989_v38 = vpack.i.bf16 %v1586_v52, %v1584_v0 }
 0x5d5   : > { %1990 = vrot.lane.b32.xlu0 %v1989_v38, %s2159_s17 }
 0x5da   : > { %v1589_v26 = vpop.f32.mrf.mxu0 }
 0x5e2   : > { %v1591_v32 = vpop.f32.mrf.mxu0 }
 0x5e3   : > { %v2004_v54 = vpack.i.bf16 %v1591_v32, %v1589_v26 }
 0x5e5   : > { %2005 = vrot.lane.b32.xlu0 %v2004_v54, %s2159_s17 }
 0x5ef   : > { %v1961_v62 = vpop.permute.xlu1 %1960 }
 0x5f0   : > { %v1963_v6 = vunpack.i.h.bf16 %v1961_v62  ;;  %v1962_v47 = vunpack.i.l.bf16 %v1961_v62 }
 0x602   : > { %v1971_v63 = vpop.permute.xlu2 %1970 }
 0x603   : > { %v1973_v51 = vunpack.i.h.bf16 %v1971_v63  ;;  %v1972_v41 = vunpack.i.l.bf16 %v1971_v63 }
 0x60a   : > { %v1956_v45 = vpop.permute.xlu0 %1955  ;;  %v1981_v9 = vpop.permute.xlu2 %1980 }
 0x60b   : > { %v1958_v12 = vunpack.i.h.bf16 %v1956_v45  ;;  %v1957_v34 = vunpack.i.l.bf16 %v1956_v45 }
 0x60d   : > { %v1700_v21 = vsel %vm1698_vm2, %v1691_v33, %v1958_v12  ;;  %v1699_v39 = vsel %vm1698_vm2, %v1690_v10, %v1957_v34 }
 0x60e   : > { %v1708_v4 = vsel %vm1707_vm14, %v1699_v39, %v1962_v47  ;;  %v1709_v46 = vsel %vm1707_vm14, %v1700_v21, %v1963_v6 }
 0x60f   : > { %v1716_v44 = vpack.c.bf16 %v1709_v46, %v1708_v4 }
 0x611   : > { %1905 = vmatmul.msk.bf16.vlgmr.msra.gmra.mxu2 %vm258_vm0, %v1716_v44 }
 0x612   : > { %v1966_v20 = vpop.permute.xlu0 %1965  ;;  %v1996_v35 = vpop.permute.xlu2 %1995 }
 0x613   : > { %v1968_v60 = vunpack.i.h.bf16 %v1966_v20  ;;  %v1967_v59 = vunpack.i.l.bf16 %v1966_v20  ;;  %v1998_v48 = vunpack.i.h.bf16 %v1996_v35 }
 0x615   : > { %v1693_v23 = vsel %vm336_vm1, %v627_v18, %v1968_v60  ;;  %v1692_v30 = vsel %vm336_vm1, %v2917_v15, %v1967_v59  ;;  %v1983_v18 = vunpack.i.h.bf16 %v1981_v9  ;;  %v1982_v15 = vunpack.i.l.bf16 %v1981_v9 }
 0x616   : > { %v1701_v28 = vsel %vm1698_vm2, %v1692_v30, %v1972_v41  ;;  %v1702_v25 = vsel %vm1698_vm2, %v1693_v23, %v1973_v51  ;;  %v1697_v0 = vsel %vm336_vm1, %v2582_v7, %v1998_v48  ;;  %v2010_v7 = vld [vmem:[%s2996_s4] ss:$0 sm:$0xff] }
 0x617   : > { %v1695_v61 = vsel %vm336_vm1, %v2562_v5, %v1983_v18  ;;  %v1694_v19 = vsel %vm336_vm1, %v2548_v55, %v1982_v15  ;;  %v1997_v5 = vunpack.i.l.bf16 %v1996_v35 }
 0x619   : > { %v1696_v52 = vsel %vm336_vm1, %v2574_v14, %v1997_v5 }
 0x61a   : > { %v1976_v29 = vpop.permute.xlu0 %1975 }
 0x61b   : > { %v1978_v37 = vunpack.i.h.bf16 %v1976_v29  ;;  %v1977_v11 = vunpack.i.l.bf16 %v1976_v29 }
 0x61d   : > { %v1710_v42 = vsel %vm1707_vm14, %v1701_v28, %v1977_v11  ;;  %v1711_v24 = vsel %vm1707_vm14, %v1702_v25, %v1978_v37 }
 0x61e   : > { %v1717_v57 = vpack.c.bf16 %v1711_v24, %v1710_v42 }
 0x621   : > { %1906 = vmatmul.msk.bf16.gmra.mxu2 %vm258_vm0, %v1717_v57 }
 0x62a   : > { %v1986_v56 = vpop.permute.xlu1 %1985 }
 0x62b   : > { %v1988_v13 = vunpack.i.h.bf16 %v1986_v56  ;;  %v1987_v1 = vunpack.i.l.bf16 %v1986_v56 }
 0x62d   : > { %v1704_v58 = vsel %vm1698_vm2, %v1695_v61, %v1988_v13  ;;  %v1703_v43 = vsel %vm1698_vm2, %v1694_v19, %v1987_v1 }
 0x63a   : > { %v2001_v2 = vpop.permute.xlu1 %2000 }
 0x63b   : > { %v2003_v16 = vunpack.i.h.bf16 %v2001_v2  ;;  %v2002_v55 = vunpack.i.l.bf16 %v2001_v2 }
 0x63d   : > { %v1706_v32 = vsel %vm1698_vm2, %v1697_v0, %v2003_v16  ;;  %v1705_v54 = vsel %vm1698_vm2, %v1696_v52, %v2002_v55 }
 0x647   : > { %v1991_v53 = vpop.permute.xlu0 %1990 }
 0x648   : > { %v1993_v27 = vunpack.i.h.bf16 %v1991_v53  ;;  %v1992_v31 = vunpack.i.l.bf16 %v1991_v53 }
 0x64a   : > { %v1712_v17 = vsel %vm1707_vm14, %v1703_v43, %v1992_v31  ;;  %v1713_v3 = vsel %vm1707_vm14, %v1704_v58, %v1993_v27 }
 0x64b   : > { %v1718_v49 = vpack.c.bf16 %v1713_v3, %v1712_v17 }
 0x64d   : > { %1907 = vmatmul.msk.bf16.gmra.mxu2 %vm258_vm0, %v1718_v49 }
 0x657   : > { %v2006_v8 = vpop.permute.xlu0 %2005 }
 0x658   : > { %v2008_v38 = vunpack.i.h.bf16 %v2006_v8  ;;  %v2007_v26 = vunpack.i.l.bf16 %v2006_v8 }
 0x65a   : > { %v1714_v36 = vsel %vm1707_vm14, %v1705_v54, %v2007_v26  ;;  %v1715_v50 = vsel %vm1707_vm14, %v1706_v32, %v2008_v38 }
 0x65b   : > { %v1719_v40 = vpack.c.bf16 %v1715_v50, %v1714_v36 }
 0x65d   : > { %1908 = vmatmul.msk.bf16.gmra.mxu2 %vm258_vm0, %v1719_v40 }
 0x694   : > { %v1761_v14 = vpop.f32.mrf.mxu2 }
 0x695   : > { %v1762_v22 = vadd.f32 %v2010_v7, %v1761_v14 }
 0x697   : > { %1781 = vst.msk [vmem:[%s224_s30] sm:$0xff] %vm258_vm0, %v1762_v22 }
 0x69c   : > { %v1763_v62 = vpop.f32.mrf.mxu2 }
 0x69d   : > { %v1764_v45 = vadd.f32 %v2010_v7, %v1763_v62 }
 0x69f   : > { %1782 = vst.msk [vmem:[%s224_s30 + $0x8] sm:$0xff] %vm258_vm0, %v1764_v45 }
 0x6a4   : > { %v1766_v12 = vpop.f32.mrf.mxu2 }
 0x6a5   : > { %v1767_v34 = vadd.f32 %v2010_v7, %v1766_v12 }
 0x6a7   : > { %1783 = vst.msk [vmem:[%s224_s30 + $0x10] sm:$0xff] %vm258_vm0, %v1767_v34 }
 0x6ac   : > { %v1768_v33 = vpop.f32.mrf.mxu2 }
 0x6ad   : > { %v1769_v10 = vadd.f32 %v2010_v7, %v1768_v33 }
 0x6af   : > { %1784 = vst.msk [vmem:[%s224_s30 + $0x18] sm:$0xff] %vm258_vm0, %v1769_v10 }
 0x6d0   : > { %v1771_v6 = vpop.f32.mrf.mxu2 }
 0x6d1   : > { %v1772_v47 = vadd.f32 %v2010_v7, %v1771_v6 }
 0x6d3   : > { %1785 = vst.msk [vmem:[%s224_s30 + $0x20] sm:$0xff] %vm258_vm0, %v1772_v47 }
 0x6d8   : > { %v1773_v21 = vpop.f32.mrf.mxu2 }
 0x6d9   : > { %v1774_v39 = vadd.f32 %v2010_v7, %v1773_v21 }
 0x6db   : > { %1786 = vst.msk [vmem:[%s224_s30 + $0x28] sm:$0xff] %vm258_vm0, %v1774_v39 }
 0x6e0   : > { %v1776_v4 = vpop.f32.mrf.mxu2 }
 0x6e1   : > { %v1777_v46 = vadd.f32 %v2010_v7, %v1776_v4 }
 0x6e3   : > { %1787 = vst.msk [vmem:[%s224_s30 + $0x30] sm:$0xff] %vm258_vm0, %v1777_v46 }
 0x6e8   : > { %v1778_v44 = vpop.f32.mrf.mxu2 }
 0x6e9   : > { %v1779_v20 = vadd.f32 %v2010_v7, %v1778_v44 }
 0x6eb   : > { %1788 = vst.msk [vmem:[%s224_s30 + $0x38] sm:$0xff] %vm258_vm0, %v1779_v20 }
 0x6ec PF: > { %s15_s18 = sadd.s32 1, %s2145_s18  }
 0x6ed   : > { %p12_p4 = scmp.ge.s32.totalorder %s15_s18, 4  }
 0x6ef   :  { %14 = sbr.rel (!%p12_p4) target bundleno = 1 (0x1), region = 70 }

</bundles_post_ra>
